<compile_context>
chip_gen: v7x
topology: tpu7x:2x2x1
jax: 0.10.0
libtpu: 0.0.40
codegen_flags: <defaults>
</compile_context>

<pallas_src>
import functools

import jax
import jax.numpy as jnp
from jax.experimental import pallas as pl
from jax.experimental.pallas import tpu as pltpu

MXU_DTYPE = jnp.bfloat16  # conv MXU operand dtype; accumulation stays f32.


def _round_up(x, m):
    return ((x + m - 1) // m) * m


def _padded_vmem_bytes(shape, dtype):
    """Approximate VMEM footprint of one buffer (lane dim -> 128, sublane dim -> tile)."""
    itemsize = jnp.dtype(dtype).itemsize
    dims = list(shape)
    if len(dims) >= 1:
        dims[-1] = _round_up(dims[-1], 128)
    if len(dims) >= 2:
        dims[-2] = _round_up(dims[-2], 8 * max(1, 4 // itemsize))
    total = itemsize
    for d in dims:
        total *= d
    return total


def _conv_gap_kernel(xp_ref, wcol_ref, bconv_ref, feat_ref, xcol_ref, *, H, W, Cin):
    """3x3 conv (in-VMEM im2col -> one MXU matmul) + bias + ReLU + global average pool.

    Per grid step (one image):
      xp_ref  : (1, H+2, W+2, Cin) f32  zero-padded raw image (only HBM activation stream)
      wcol_ref: (9*Cin, FP)        bf16 conv weight (K un-padded)
      bconv_ref:(1, FP)            f32  conv bias
      feat_ref: (1, 1, FP)         f32  pooled feature row for this image
      xcol_ref: (H, W, 9*Cin)      f32  VMEM scratch: im2col taps
    """
    # Build the im2col matrix entirely in VMEM: 9 shifted (H, W, Cin) windows of the
    # padded image written into contiguous lane slices (no HBM-materialized patches).
    t = 0
    for dy in range(3):
        for dx in range(3):
            xcol_ref[:, :, t * Cin:(t + 1) * Cin] = xp_ref[0, dy:dy + H, dx:dx + W, :]
            t += 1

    # One MXU push: (H*W, 9*Cin) @ (9*Cin, FP), bf16 operands, f32 accumulation.
    # M = H*W (256 at demo size) fills the 256-wide MXU on v6e/v7x; K stays 36.
    xcol = xcol_ref[...].reshape(H * W, 9 * Cin).astype(MXU_DTYPE)
    conv = jnp.dot(xcol, wcol_ref[...], preferred_element_type=jnp.float32)
    conv = jnp.maximum(conv + bconv_ref[...], 0.0)            # bias + ReLU in f32 (v5e-safe)

    # Global average pool in f32; the 1/(H*W) scale is applied here (not folded into
    # bf16 weights) so feature accumulation/scaling stays full precision.
    feat_ref[...] = (jnp.sum(conv, axis=0, keepdims=True) * (1.0 / float(H * W)))[None]


def _head_kernel(feat_ref, wh_ref, bh_ref, o_ref):
    """Fused dual head: one batched (B, FP) @ (FP, NP) f32 matmul + bias (lane-dense)."""
    o_ref[...] = jnp.dot(feat_ref[...], wh_ref[...],
                         preferred_element_type=jnp.float32) + bh_ref[...]


def detection_net_forward(x_nchw, params):
    """NCHW input -> (bbox (B, 4), logits (B, num_classes)) via two pallas_calls."""
    x = jnp.transpose(x_nchw, (0, 2, 3, 1)).astype(jnp.float32)   # NHWC
    B, H, W, Cin = x.shape
    F = params["w_conv"].shape[-1]
    NC = params["w2"].shape[-1]

    K = 9 * Cin                     # im2col contraction dim (NOT padded in HBM)
    FP = _round_up(F, 128)          # lane-dense feature dim
    NH = 4 + NC                     # fused head width (bbox ++ classes)
    NP = _round_up(NH, 128)         # lane-dense fused head output

    # Only activation streamed from HBM: 1-pixel zero-padded raw image.  Kept f32 so the
    # in-kernel halo window loads stay on the unpacked (8-sublane) path.
    xp = jnp.pad(x, ((0, 0), (1, 1), (1, 1), (0, 0)))

    # Conv weight as a single (K, F) matrix: only the feature (output-lane) dim is padded.
    w_col = params["w_conv"].reshape(K, F)
    w_col = jnp.pad(w_col, ((0, 0), (0, FP - F))).astype(MXU_DTYPE)
    b_conv = jnp.pad(params["b_conv"].reshape(1, F), ((0, 0), (0, FP - F))).astype(jnp.float32)

    conv_kernel = functools.partial(_conv_gap_kernel, H=H, W=W, Cin=Cin)

    # Derive the VMEM budget from the actual (padded, double-buffered) buffers instead of
    # a fixed 32 MiB (v7x has only 64 MiB physical VMEM).
    vmem_needed = (2 * _padded_vmem_bytes((1, H + 2, W + 2, Cin), jnp.float32)
                   + 2 * _padded_vmem_bytes((K, FP), MXU_DTYPE)
                   + 2 * _padded_vmem_bytes((1, FP), jnp.float32)
                   + 2 * _padded_vmem_bytes((1, 1, FP), jnp.float32)
                   + _padded_vmem_bytes((H, W, K), jnp.float32))
    vmem_limit = int(min(max(4 * vmem_needed, 16 * 1024 * 1024), 48 * 1024 * 1024))

    feat3 = pl.pallas_call(
        conv_kernel,
        out_shape=jax.ShapeDtypeStruct((B, 1, FP), jnp.float32),
        grid_spec=pltpu.PrefetchScalarGridSpec(
            num_scalar_prefetch=0,
            grid=(B,),
            in_specs=[
                pl.BlockSpec((1, H + 2, W + 2, Cin), lambda b: (b, 0, 0, 0)),  # raw image
                pl.BlockSpec((K, FP), lambda b: (0, 0)),                       # conv weight
                pl.BlockSpec((1, FP), lambda b: (0, 0)),                       # conv bias
            ],
            out_specs=pl.BlockSpec((1, 1, FP), lambda b: (b, 0, 0)),           # pooled features
            scratch_shapes=[pltpu.VMEM((H, W, K), jnp.float32)],               # im2col scratch
        ),
        compiler_params=pltpu.CompilerParams(
            dimension_semantics=("parallel",),      # batch axis shards across TCs on v7x
            vmem_limit_bytes=vmem_limit,
        ),
    )(xp, w_col, b_conv)
    feat = feat3[:, 0, :]                            # (B, FP) f32, zero-padded beyond F

    # Fused dual head: [w1 | w2], zero-padded to lane-dense widths, applied to the whole
    # batch in one matmul (f32 -> no extra rounding of the pooled features).
    w_head = jnp.concatenate([params["w1"], params["w2"]], axis=1)
    w_head = jnp.pad(w_head, ((0, FP - F), (0, NP - NH))).astype(jnp.float32)
    b_head = jnp.concatenate([params["b1"], params["b2"]]).reshape(1, NH)
    b_head = jnp.pad(b_head, ((0, 0), (0, NP - NH))).astype(jnp.float32)

    out = pl.pallas_call(
        _head_kernel,
        out_shape=jax.ShapeDtypeStruct((B, NP), jnp.float32),
        grid=(1,),
        in_specs=[
            pl.BlockSpec((B, FP), lambda i: (0, 0)),
            pl.BlockSpec((FP, NP), lambda i: (0, 0)),
            pl.BlockSpec((1, NP), lambda i: (0, 0)),
        ],
        out_specs=pl.BlockSpec((B, NP), lambda i: (0, 0)),
        compiler_params=pltpu.CompilerParams(dimension_semantics=("arbitrary",)),
    )(feat, w_head, b_head)

    return out[:, :4], out[:, 4:NH]


def init_params(key, cin, n_features, num_classes):
    k = jax.random.split(key, 6)
    sc = 1.0 / jnp.sqrt(cin * 9.0)
    sf = 1.0 / jnp.sqrt(float(n_features))
    return {
        "w_conv": jax.random.normal(k[0], (3, 3, cin, n_features), jnp.float32) * sc,
        "b_conv": jax.random.normal(k[1], (n_features,), jnp.float32) * sc,
        "w1": jax.random.normal(k[2], (n_features, 4), jnp.float32) * sf,
        "b1": jax.random.normal(k[3], (4,), jnp.float32) * sf,
        "w2": jax.random.normal(k[4], (n_features, num_classes), jnp.float32) * sf,
        "b2": jax.random.normal(k[5], (num_classes,), jnp.float32) * sf,
    }


def reference_forward(x_nchw, params, *, conv_operand_dtype=jnp.float32):
    """Pure-JAX reference (same math as the module).  `conv_operand_dtype=bf16` rounds the
    conv matmul operands the same way the kernel does; heads/GAP stay f32 like the kernel."""
    def cast(a):
        return a.astype(conv_operand_dtype).astype(jnp.float32)

    x = jnp.transpose(x_nchw, (0, 2, 3, 1)).astype(jnp.float32)
    xp = jnp.pad(cast(x), ((0, 0), (1, 1), (1, 1), (0, 0)))
    B, Hp, Wp, Cin = xp.shape
    H, W = Hp - 2, Wp - 2
    F = params["w_conv"].shape[-1]
    wc = cast(params["w_conv"])
    acc = jnp.zeros((B, H, W, F), jnp.float32)
    for dy in range(3):
        for dx in range(3):
            acc = acc + jnp.einsum("bhwc,cf->bhwf",
                                   xp[:, dy:dy + H, dx:dx + W, :], wc[dy, dx])
    acc = jnp.maximum(acc + params["b_conv"], 0.0)
    feat = acc.mean(axis=(1, 2))
    bbox = feat @ params["w1"] + params["b1"]
    logits = feat @ params["w2"] + params["b2"]
    return bbox, logits


if __name__ == "__main__":
    B, Cin, H, W = 2, 4, 16, 16          # small NCHW batch, as in the PyTorch module
    n_features = 32                      # pre_model.fc.in_features (synthetic)
    num_classes = 200                    # module default

    key = jax.random.PRNGKey(0)
    kx, kp = jax.random.split(key)
    x = jax.random.normal(kx, (B, Cin, H, W), jnp.float32)
    params = init_params(kp, Cin, n_features, num_classes)

    bbox, logits = detection_net_forward(x, params)
    bbox = jax.block_until_ready(bbox)
    logits = jax.block_until_ready(logits)

    assert bbox.shape == (B, 4) and logits.shape == (B, num_classes)

    # Reference with the same bf16 rounding of the conv operands (f32 everywhere else).
    ref_bbox, ref_logits = reference_forward(x, params, conv_operand_dtype=MXU_DTYPE)
    assert jnp.allclose(bbox, ref_bbox, atol=2e-2, rtol=2e-2)
    assert jnp.allclose(logits, ref_logits, atol=2e-2, rtol=2e-2)

    print("KERNEL_OK")
</pallas_src>

<mosaic_0001>
module attributes {stable_mosaic.version = 11 : i64} {
  func.func @_conv_gap_kernel(%arg0: i32, %arg1: memref<1x18x18x4xf32, #tpu.memory_space<vmem>>, %arg2: memref<36x128xbf16, #tpu.memory_space<vmem>>, %arg3: memref<1x128xf32, #tpu.memory_space<vmem>>, %arg4: memref<1x1x128xf32, #tpu.memory_space<vmem>>, %arg5: memref<16x16x36xf32, #tpu.memory_space<vmem>>) attributes {dimension_semantics = [#tpu.dimension_semantics<parallel>], iteration_bounds = array<i64: 2>, scalar_prefetch = 0 : i64, scratch_operands = 1 : i64, tpu.core_type = #tpu.core_type<tc>, window_params = [{transform_indices = @transform_0, window_bounds = array<i64: 1, 18, 18, 4>}, {pipeline_mode = #tpu.pipeline_mode<synchronous>, transform_indices = @transform_1, window_bounds = array<i64: 36, 128>}, {pipeline_mode = #tpu.pipeline_mode<synchronous>, transform_indices = @transform_2, window_bounds = array<i64: 1, 128>}, {transform_indices = @transform_3, window_bounds = array<i64: 1, 1, 128>}]} {
    %c0 = arith.constant 0 : index
    %c0_0 = arith.constant 0 : index
    %c0_1 = arith.constant 0 : index
    %c0_2 = arith.constant 0 : index
    %0 = vector.load %arg1[%c0, %c0_0, %c0_1, %c0_2] : memref<1x18x18x4xf32, #tpu.memory_space<vmem>>, vector<1x16x16x4xf32>
    %1 = vector.shape_cast %0 : vector<1x16x16x4xf32> to vector<16x16x4xf32>
    %c0_3 = arith.constant 0 : index
    %c0_4 = arith.constant 0 : index
    %c0_5 = arith.constant 0 : index
    %2 = vector.load %arg5[%c0_3, %c0_4, %c0_5] : memref<16x16x36xf32, #tpu.memory_space<vmem>>, vector<16x16x4xf32>
    tpu.vector_store %arg5[%c0_3, %c0_4, %c0_5], %1 {strides = array<i32>} : memref<16x16x36xf32, #tpu.memory_space<vmem>>, vector<16x16x4xf32>,
    %c0_6 = arith.constant 0 : index
    %c0_7 = arith.constant 0 : index
    %c1 = arith.constant 1 : index
    %c0_8 = arith.constant 0 : index
    %3 = vector.load %arg1[%c0_6, %c0_7, %c1, %c0_8] : memref<1x18x18x4xf32, #tpu.memory_space<vmem>>, vector<1x16x16x4xf32>
    %4 = vector.shape_cast %3 : vector<1x16x16x4xf32> to vector<16x16x4xf32>
    %c0_9 = arith.constant 0 : index
    %c0_10 = arith.constant 0 : index
    %c4 = arith.constant 4 : index
    %5 = vector.load %arg5[%c0_9, %c0_10, %c4] : memref<16x16x36xf32, #tpu.memory_space<vmem>>, vector<16x16x4xf32>
    tpu.vector_store %arg5[%c0_9, %c0_10, %c4], %4 {strides = array<i32>} : memref<16x16x36xf32, #tpu.memory_space<vmem>>, vector<16x16x4xf32>,
    %c0_11 = arith.constant 0 : index
    %c0_12 = arith.constant 0 : index
    %c2 = arith.constant 2 : index
    %c0_13 = arith.constant 0 : index
    %6 = vector.load %arg1[%c0_11, %c0_12, %c2, %c0_13] : memref<1x18x18x4xf32, #tpu.memory_space<vmem>>, vector<1x16x16x4xf32>
    %7 = vector.shape_cast %6 : vector<1x16x16x4xf32> to vector<16x16x4xf32>
    %c0_14 = arith.constant 0 : index
    %c0_15 = arith.constant 0 : index
    %c8 = arith.constant 8 : index
    %8 = vector.load %arg5[%c0_14, %c0_15, %c8] : memref<16x16x36xf32, #tpu.memory_space<vmem>>, vector<16x16x4xf32>
    tpu.vector_store %arg5[%c0_14, %c0_15, %c8], %7 {strides = array<i32>} : memref<16x16x36xf32, #tpu.memory_space<vmem>>, vector<16x16x4xf32>,
    %c0_16 = arith.constant 0 : index
    %c1_17 = arith.constant 1 : index
    %c0_18 = arith.constant 0 : index
    %c0_19 = arith.constant 0 : index
    %9 = vector.load %arg1[%c0_16, %c1_17, %c0_18, %c0_19] : memref<1x18x18x4xf32, #tpu.memory_space<vmem>>, vector<1x16x16x4xf32>
    %10 = vector.shape_cast %9 : vector<1x16x16x4xf32> to vector<16x16x4xf32>
    %c0_20 = arith.constant 0 : index
    %c0_21 = arith.constant 0 : index
    %c12 = arith.constant 12 : index
    %11 = vector.load %arg5[%c0_20, %c0_21, %c12] : memref<16x16x36xf32, #tpu.memory_space<vmem>>, vector<16x16x4xf32>
    tpu.vector_store %arg5[%c0_20, %c0_21, %c12], %10 {strides = array<i32>} : memref<16x16x36xf32, #tpu.memory_space<vmem>>, vector<16x16x4xf32>,
    %c0_22 = arith.constant 0 : index
    %c1_23 = arith.constant 1 : index
    %c1_24 = arith.constant 1 : index
    %c0_25 = arith.constant 0 : index
    %12 = vector.load %arg1[%c0_22, %c1_23, %c1_24, %c0_25] : memref<1x18x18x4xf32, #tpu.memory_space<vmem>>, vector<1x16x16x4xf32>
    %13 = vector.shape_cast %12 : vector<1x16x16x4xf32> to vector<16x16x4xf32>
    %c0_26 = arith.constant 0 : index
    %c0_27 = arith.constant 0 : index
    %c16 = arith.constant 16 : index
    %14 = vector.load %arg5[%c0_26, %c0_27, %c16] : memref<16x16x36xf32, #tpu.memory_space<vmem>>, vector<16x16x4xf32>
    tpu.vector_store %arg5[%c0_26, %c0_27, %c16], %13 {strides = array<i32>} : memref<16x16x36xf32, #tpu.memory_space<vmem>>, vector<16x16x4xf32>,
    %c0_28 = arith.constant 0 : index
    %c1_29 = arith.constant 1 : index
    %c2_30 = arith.constant 2 : index
    %c0_31 = arith.constant 0 : index
    %15 = vector.load %arg1[%c0_28, %c1_29, %c2_30, %c0_31] : memref<1x18x18x4xf32, #tpu.memory_space<vmem>>, vector<1x16x16x4xf32>
    %16 = vector.shape_cast %15 : vector<1x16x16x4xf32> to vector<16x16x4xf32>
    %c0_32 = arith.constant 0 : index
    %c0_33 = arith.constant 0 : index
    %c20 = arith.constant 20 : index
    %17 = vector.load %arg5[%c0_32, %c0_33, %c20] : memref<16x16x36xf32, #tpu.memory_space<vmem>>, vector<16x16x4xf32>
    tpu.vector_store %arg5[%c0_32, %c0_33, %c20], %16 {strides = array<i32>} : memref<16x16x36xf32, #tpu.memory_space<vmem>>, vector<16x16x4xf32>,
    %c0_34 = arith.constant 0 : index
    %c2_35 = arith.constant 2 : index
    %c0_36 = arith.constant 0 : index
    %c0_37 = arith.constant 0 : index
    %18 = vector.load %arg1[%c0_34, %c2_35, %c0_36, %c0_37] : memref<1x18x18x4xf32, #tpu.memory_space<vmem>>, vector<1x16x16x4xf32>
    %19 = vector.shape_cast %18 : vector<1x16x16x4xf32> to vector<16x16x4xf32>
    %c0_38 = arith.constant 0 : index
    %c0_39 = arith.constant 0 : index
    %c24 = arith.constant 24 : index
    %20 = vector.load %arg5[%c0_38, %c0_39, %c24] : memref<16x16x36xf32, #tpu.memory_space<vmem>>, vector<16x16x4xf32>
    tpu.vector_store %arg5[%c0_38, %c0_39, %c24], %19 {strides = array<i32>} : memref<16x16x36xf32, #tpu.memory_space<vmem>>, vector<16x16x4xf32>,
    %c0_40 = arith.constant 0 : index
    %c2_41 = arith.constant 2 : index
    %c1_42 = arith.constant 1 : index
    %c0_43 = arith.constant 0 : index
    %21 = vector.load %arg1[%c0_40, %c2_41, %c1_42, %c0_43] : memref<1x18x18x4xf32, #tpu.memory_space<vmem>>, vector<1x16x16x4xf32>
    %22 = vector.shape_cast %21 : vector<1x16x16x4xf32> to vector<16x16x4xf32>
    %c0_44 = arith.constant 0 : index
    %c0_45 = arith.constant 0 : index
    %c28 = arith.constant 28 : index
    %23 = vector.load %arg5[%c0_44, %c0_45, %c28] : memref<16x16x36xf32, #tpu.memory_space<vmem>>, vector<16x16x4xf32>
    tpu.vector_store %arg5[%c0_44, %c0_45, %c28], %22 {strides = array<i32>} : memref<16x16x36xf32, #tpu.memory_space<vmem>>, vector<16x16x4xf32>,
    %c0_46 = arith.constant 0 : index
    %c2_47 = arith.constant 2 : index
    %c2_48 = arith.constant 2 : index
    %c0_49 = arith.constant 0 : index
    %24 = vector.load %arg1[%c0_46, %c2_47, %c2_48, %c0_49] : memref<1x18x18x4xf32, #tpu.memory_space<vmem>>, vector<1x16x16x4xf32>
    %25 = vector.shape_cast %24 : vector<1x16x16x4xf32> to vector<16x16x4xf32>
    %c0_50 = arith.constant 0 : index
    %c0_51 = arith.constant 0 : index
    %c32 = arith.constant 32 : index
    %26 = vector.load %arg5[%c0_50, %c0_51, %c32] : memref<16x16x36xf32, #tpu.memory_space<vmem>>, vector<16x16x4xf32>
    tpu.vector_store %arg5[%c0_50, %c0_51, %c32], %25 {strides = array<i32>} : memref<16x16x36xf32, #tpu.memory_space<vmem>>, vector<16x16x4xf32>,
    %c0_52 = arith.constant 0 : index
    %c0_53 = arith.constant 0 : index
    %c0_54 = arith.constant 0 : index
    %27 = vector.load %arg5[%c0_52, %c0_53, %c0_54] : memref<16x16x36xf32, #tpu.memory_space<vmem>>, vector<16x16x36xf32>
    %28 = vector.shape_cast %27 : vector<16x16x36xf32> to vector<256x36xf32>
    %29 = arith.truncf %28 : vector<256x36xf32> to vector<256x36xbf16>
    %c0_55 = arith.constant 0 : index
    %c0_56 = arith.constant 0 : index
    %30 = vector.load %arg2[%c0_55, %c0_56] : memref<36x128xbf16, #tpu.memory_space<vmem>>, vector<36x128xbf16>
    %cst = arith.constant dense<0.000000e+00> : vector<256x128xf32>
    %31 = tpu.matmul %29, %30, %cst {dimension_numbers = #tpu.dot_dimension_numbers<[1], [0], [0], [1], [0, 0, 1, 1], [], []>} : vector<256x36xbf16>, vector<36x128xbf16>, vector<256x128xf32> -> vector<256x128xf32>
    %c0_57 = arith.constant 0 : index
    %c0_58 = arith.constant 0 : index
    %32 = vector.load %arg3[%c0_57, %c0_58] : memref<1x128xf32, #tpu.memory_space<vmem>>, vector<1x128xf32>
    %33 = vector.broadcast %32 : vector<1x128xf32> to vector<256x128xf32>
    %34 = arith.addf %31, %33 : vector<256x128xf32>
    %cst_59 = arith.constant 0.000000e+00 : f32
    %35 = vector.broadcast %cst_59 : f32 to vector<256x128xf32>
    %36 = arith.maximumf %34, %35 : vector<256x128xf32>
    %cst_60 = arith.constant dense<0.000000e+00> : vector<128xf32>
    %37 = vector.multi_reduction <add>, %36, %cst_60 [0] : vector<256x128xf32> to vector<128xf32>
    %38 = vector.shape_cast %37 : vector<128xf32> to vector<1x128xf32>
    %cst_61 = arith.constant 3.906250e-03 : f32
    %39 = vector.broadcast %cst_61 : f32 to vector<1x128xf32>
    %40 = arith.mulf %38, %39 : vector<1x128xf32>
    %41 = vector.shape_cast %40 : vector<1x128xf32> to vector<1x1x128xf32>
    %c0_62 = arith.constant 0 : index
    %c0_63 = arith.constant 0 : index
    %c0_64 = arith.constant 0 : index
    %42 = vector.load %arg4[%c0_62, %c0_63, %c0_64] : memref<1x1x128xf32, #tpu.memory_space<vmem>>, vector<1x1x128xf32>
    tpu.vector_store %arg4[%c0_62, %c0_63, %c0_64], %41 {strides = array<i32>} : memref<1x1x128xf32, #tpu.memory_space<vmem>>, vector<1x1x128xf32>,
    return
  }
  func.func @transform_0(%arg0: i32) -> (i32, i32, i32, i32) {
    %c0_i32 = arith.constant 0 : i32
    %c0_i32_0 = arith.constant 0 : i32
    %c0_i32_1 = arith.constant 0 : i32
    %c0_i32_2 = arith.constant 0 : i32
    return %arg0, %c0_i32, %c0_i32_0, %c0_i32_1 : i32, i32, i32, i32
  }
  func.func @transform_1(%arg0: i32) -> (i32, i32) {
    %c0_i32 = arith.constant 0 : i32
    %c0_i32_0 = arith.constant 0 : i32
    %c0_i32_1 = arith.constant 0 : i32
    return %c0_i32, %c0_i32_0 : i32, i32
  }
  func.func @transform_2(%arg0: i32) -> (i32, i32) {
    %c0_i32 = arith.constant 0 : i32
    %c0_i32_0 = arith.constant 0 : i32
    %c0_i32_1 = arith.constant 0 : i32
    return %c0_i32, %c0_i32_0 : i32, i32
  }
  func.func @transform_3(%arg0: i32) -> (i32, i32, i32) {
    %c0_i32 = arith.constant 0 : i32
    %c0_i32_0 = arith.constant 0 : i32
    %c0_i32_1 = arith.constant 0 : i32
    return %arg0, %c0_i32, %c0_i32_0 : i32, i32, i32
  }
}

</mosaic_0001>

<bundles_post_ra>
// kernel: tpu_custom_call.1
= control target key start
LH: loop header
LB: loop body
LE: loop exit
PB: predicated region body
PF: predicated region fallthrough
CT: control target
= control target key end

     0   :  { %8 = vsyncpa [#allocation4], 0  ;;  %s3761_s0 = inlined_call_operand.vmem [shape: f32[2,18,18,4], index: 0, kind: input, shape index: {}]   ;;  %s3762_s1 = inlined_call_operand.vmem [shape: bf16[36,128], index: 1, kind: input, shape index: {}]   ;;  %s3763_s2 = inlined_call_operand.vmem [shape: f32[1,128], index: 2, kind: input, shape index: {}]   ;;  %s3764_s3 = inlined_call_operand.hbm [shape: f32[2,1,128], index: 3, kind: output, shape index: {}]  }
   0x1   :  { %10 = vsyncpa [#allocation4 + $0x1], 0  ;;  %s2637_s12 = smov 0   ;;  %s2639_s13 = smov 0  }
   0x2   :  { %s2641_s14 = smov 0   ;;  %s2643_s15 = smov 0  }
   0x3 LB: > { %s2658_s16 = sadd.s32 4294967295, %s2606_s15   ;;  %s2208_s17 = sadd.s32 4294967294, %s2606_s15   ;;  %s2606_s15 = sphi %s2643_s15, %s3776_s15   ;;  %s2602_s14 = sphi %s2641_s14, %s3775_s14   ;;  %s2598_s13 = sphi %s2639_s13, %s3774_s13   ;;  %s2594_s12 = sphi %s2637_s12, %s3773_s12  }
   0x4   : > { %s2662_s18 = sadd.s32 1, %s2606_s15   ;;  %s91_s19 = sadd.s32 1, %s2602_s14 }
   0x5   : > { %s88_s20 = ssub.s32 %s2606_s15, %s2662_s18  ;;  %p101_p0 = scmp.ne.s32.totalorder %s2602_s14, %s2598_s13 }
   0x6   : > { %p89_p1 = scmp.eq.s32.totalorder %s88_s20, 0  ;;  %p102_p2 = scmp.eq.s32.totalorder %s2658_s16, 1 }
   0x7   : > { %p107_p3 = scmp.ne.s32.totalorder %s2598_s13, %s2594_s12  ;;  %p108_p4 = scmp.eq.s32.totalorder %s2208_s17, 1 }
   0x8   : > { %s2673_s21 = scalar_select %p89_p1, %s2602_s14, %s91_s19  }
   0x9   : > { %p2675_p5 = por %p102_p2, %p101_p0  ;;  %p2679_p6 = por %p108_p4, %p107_p3 }
   0xa   : > { %p2211_p7 = scmp.ge.s32.totalorder %s2606_s15, 1  ;;  %p140_p8 = scmp.lt.s32.totalorder %s2606_s15, 3 }
   0xc   : > { %p141_p9 = pnand %p2211_p7, %p140_p8 }
   0xe   : > { %144 = sbr.rel (%p141_p9) target bundleno = 915 (0x393), region = 32 }
  0x15   : > { %p163_p10 = scmp.lt.s32.totalorder %s2658_s16, 1  ;;  %s2608_s29 = smov 4   ;;  %vm201_vm0 = vcmask 31744   ;;  %vm394_vm1 = vcmask 64544   ;;  %vm1904_vm2 = vcmask 1041408   ;;  %vm587_vm3 = vcmask 97344  }
  0x16   : > { %s2609_s30 = smov 8   ;;  %s2610_s4 = smov 12   ;;  %vm781_vm4 = vcmask 130144   ;;  %vm974_vm5 = vcmask 162944   ;;  %vm1167_vm6 = vcmask 195744   ;;  %vm1361_vm7 = vcmask 228544  }
  0x17   : > { %s164_s24 = scalar_select %p163_p10, %s2658_s16, 1  ;;  %vm1554_vm8 = vcmask 261344   ;;  %vm1747_vm9 = vcmask 294144   ;;  %vm1855_vm10 = vcmask 293888  }
  0x18   : > { %s2611_s5 = smov 16   ;;  %s2612_s6 = smov 20  }
  0x19   : > { %s2493_s25 = smul.u32 432, %s164_s24  ;;  %s2613_s7 = smov 24  }
  0x1a   : > { %s2614_s17 = smov 28   ;;  %s2615_s24 = smov 32  }
  0x1b   : > { %s2690_s28 = scalar_lea.vmem %s3761_s0, %s2493_s25  ;;  %s161_s27 = sand.u32 1, %s2598_s13  }
  0x1c   : > { %v2693_v0 = vld [vmem:[%s2690_s28 + $0x19] sm:$0xff]  ;;  %v234_v1 = vld [vmem:[%s2690_s28 + $0x1] sm:$0xff]  ;;  %v235_v3 = vld [vmem:[%s2690_s28 + $0x9] sm:$0xff] }
  0x1d   : > { %302 = vrot.lane.b32.xlu1 %v2693_v0, %s2608_s29  ;;  %298 = vrot.lane.b32.xlu0 %v234_v1, %s2608_s29  ;;  %v2700_v2 = vld [vmem:[%s2690_s28 + $0x21] sm:$0xff]  ;;  %v2707_v4 = vld [vmem:[%s2690_s28 + $0x39] sm:$0xff] }
  0x1e   : > { %v2710_v5 = vld [vmem:[%s2690_s28 + $0x31] sm:$0xff]  ;;  %v2720_v7 = vld [vmem:[%s2690_s28 + $0x49] sm:$0xff]  ;;  %v2730_v9 = vld [vmem:[%s2690_s28 + $0x61] sm:$0xff] }
  0x1f   : > { %v2717_v6 = vld [vmem:[%s2690_s28 + $0x51] sm:$0xff]  ;;  %v2727_v8 = vld [vmem:[%s2690_s28 + $0x69] sm:$0xff]  ;;  %v2737_v10 = vld [vmem:[%s2690_s28 + $0x81] sm:$0xff] }
  0x20   : > { %v2740_v11 = vld [vmem:[%s2690_s28 + $0x79] sm:$0xff]  ;;  %v2754_v15 = vld [vmem:[%s2690_s28 + $0x91] sm:$0xff]  ;;  %v170_v17 = vld [vmem:[%s2690_s28 + $0x8] sm:$0xff] }
  0x21   : > { %304 = vrot.lane.b32.xlu1 %v2700_v2, %s2608_s29  ;;  %300 = vrot.lane.b32.xlu0 %v235_v3, %s2608_s29  ;;  %v2747_v12 = vld [vmem:[%s2690_s28 + $0x18] sm:$0xff]  ;;  %v169_v13 = vld [vmem:[%s2690_s28] sm:$0xff]  ;;  %203 = vst.msk [vmem:[#allocation2 + $0x8] sm:$0xff] %vm201_vm0, %v170_v17 }
  0x22   : > { %v2751_v14 = vld [vmem:[%s2690_s28 + $0x99] sm:$0xff]  ;;  %204 = vst.msk [vmem:[#allocation2 + $0x10] sm:$0xff] %vm201_vm0, %v2747_v12  ;;  %202 = vst.msk [vmem:[#allocation2] sm:$0xff] %vm201_vm0, %v169_v13  ;;  %v2766_v18 = vld [vmem:[%s2690_s28 + $0xb1] sm:$0xff] }
  0x23   : > { %v2760_v16 = vld [vmem:[%s2690_s28 + $0x20] sm:$0xff]  ;;  %v2770_v19 = vld [vmem:[%s2690_s28 + $0x38] sm:$0xff]  ;;  %v2773_v20 = vld [vmem:[%s2690_s28 + $0x30] sm:$0xff] }
  0x24   : > { %205 = vst.msk [vmem:[#allocation2 + $0x18] sm:$0xff] %vm201_vm0, %v2760_v16  ;;  %v2780_v21 = vld [vmem:[%s2690_s28 + $0xa9] sm:$0xff]  ;;  %207 = vst.msk [vmem:[#allocation2 + $0x28] sm:$0xff] %vm201_vm0, %v2770_v19  ;;  %v2798_v25 = vld [vmem:[%s2690_s28 + $0x60] sm:$0xff] }
  0x25   : > { %308 = vrot.lane.b32.xlu1 %v2707_v4, %s2608_s29  ;;  %306 = vrot.lane.b32.xlu0 %v2710_v5, %s2608_s29  ;;  %206 = vst.msk [vmem:[#allocation2 + $0x20] sm:$0xff] %vm201_vm0, %v2773_v20  ;;  %v2787_v22 = vld [vmem:[%s2690_s28 + $0x50] sm:$0xff]  ;;  %v2792_v23 = vld [vmem:[%s2690_s28 + $0x48] sm:$0xff]  ;;  %210 = vst.msk [vmem:[#allocation2 + $0x40] sm:$0xff] %vm201_vm0, %v2798_v25 }
  0x26   : > { %209 = vst.msk [vmem:[#allocation2 + $0x38] sm:$0xff] %vm201_vm0, %v2787_v22  ;;  %v2795_v24 = vld [vmem:[%s2690_s28 + $0x68] sm:$0xff]  ;;  %208 = vst.msk [vmem:[#allocation2 + $0x30] sm:$0xff] %vm201_vm0, %v2792_v23  ;;  %v2807_v26 = vld [vmem:[%s2690_s28 + $0x80] sm:$0xff] }
  0x27   : > { %211 = vst.msk [vmem:[#allocation2 + $0x48] sm:$0xff] %vm201_vm0, %v2795_v24  ;;  %v2810_v27 = vld [vmem:[%s2690_s28 + $0x78] sm:$0xff]  ;;  %v2816_v29 = vld [vmem:[%s2690_s28 + $0xc9] sm:$0xff]  ;;  %v2819_v30 = vld [vmem:[%s2690_s28 + $0xc1] sm:$0xff] }
  0x28   : > { %v2813_v28 = vld [vmem:[%s2690_s28 + $0x98] sm:$0xff]  ;;  %213 = vst.msk [vmem:[#allocation2 + $0x58] sm:$0xff] %vm201_vm0, %v2807_v26  ;;  %212 = vst.msk [vmem:[#allocation2 + $0x50] sm:$0xff] %vm201_vm0, %v2810_v27  ;;  %v2828_v31 = vld [vmem:[%s2690_s28 + $0x90] sm:$0xff] }
  0x29   : > { %312 = vrot.lane.b32.xlu1 %v2717_v6, %s2608_s29  ;;  %310 = vrot.lane.b32.xlu0 %v2720_v7, %s2608_s29  ;;  %215 = vst.msk [vmem:[#allocation2 + $0x68] sm:$0xff] %vm201_vm0, %v2813_v28  ;;  %v2831_v32 = vld [vmem:[%s2690_s28 + $0xb0] sm:$0xff]  ;;  %v2834_v33 = vld [vmem:[%s2690_s28 + $0xa8] sm:$0xff]  ;;  %214 = vst.msk [vmem:[#allocation2 + $0x60] sm:$0xff] %vm201_vm0, %v2828_v31 }
  0x2a   : > { %217 = vst.msk [vmem:[#allocation2 + $0x78] sm:$0xff] %vm201_vm0, %v2831_v32  ;;  %216 = vst.msk [vmem:[#allocation2 + $0x70] sm:$0xff] %vm201_vm0, %v2834_v33  ;;  %v2847_v34 = vld [vmem:[%s2690_s28 + $0xc8] sm:$0xff]  ;;  %v2850_v35 = vld [vmem:[%s2690_s28 + $0xc0] sm:$0xff] }
  0x2b   : > { %219 = vst.msk [vmem:[#allocation2 + $0x88] sm:$0xff] %vm201_vm0, %v2847_v34  ;;  %218 = vst.msk [vmem:[#allocation2 + $0x80] sm:$0xff] %vm201_vm0, %v2850_v35  ;;  %v2857_v36 = vld [vmem:[%s2690_s28 + $0xe0] sm:$0xff]  ;;  %v2860_v37 = vld [vmem:[%s2690_s28 + $0xd8] sm:$0xff] }
  0x2c   : > { %v2863_v38 = vld [vmem:[%s2690_s28 + $0xf8] sm:$0xff]  ;;  %221 = vst.msk [vmem:[#allocation2 + $0x98] sm:$0xff] %vm201_vm0, %v2857_v36  ;;  %220 = vst.msk [vmem:[#allocation2 + $0x90] sm:$0xff] %vm201_vm0, %v2860_v37  ;;  %v2872_v39 = vld [vmem:[%s2690_s28 + $0xf0] sm:$0xff] }
  0x2d   : > { %316 = vrot.lane.b32.xlu1 %v2727_v8, %s2608_s29  ;;  %314 = vrot.lane.b32.xlu0 %v2730_v9, %s2608_s29  ;;  %223 = vst.msk [vmem:[#allocation2 + $0xa8] sm:$0xff] %vm201_vm0, %v2863_v38  ;;  %v2875_v40 = vld [vmem:[%s2690_s28 + $0x110] sm:$0xff]  ;;  %v2878_v41 = vld [vmem:[%s2690_s28 + $0x108] sm:$0xff]  ;;  %222 = vst.msk [vmem:[#allocation2 + $0xa0] sm:$0xff] %vm201_vm0, %v2872_v39 }
  0x2e   : > { %225 = vst.msk [vmem:[#allocation2 + $0xb8] sm:$0xff] %vm201_vm0, %v2875_v40  ;;  %224 = vst.msk [vmem:[#allocation2 + $0xb0] sm:$0xff] %vm201_vm0, %v2878_v41  ;;  %v253_v42 = vld [vmem:[%s2690_s28 + $0xe1] sm:$0xff]  ;;  %v252_v43 = vld [vmem:[%s2690_s28 + $0xd9] sm:$0xff] }
  0x2f   : > { %v2893_v44 = vld [vmem:[%s2690_s28 + $0x128] sm:$0xff]  ;;  %v2896_v45 = vld [vmem:[%s2690_s28 + $0x120] sm:$0xff]  ;;  %v254_v47 = vld [vmem:[%s2690_s28 + $0xf1] sm:$0xff] }
  0x30   : > { %3769 = vst [vmem:[#allocation6_spill] sm:$0xff] %v2893_v44  ;;  %3770 = vst [vmem:[#allocation7_spill] sm:$0xff] %v2896_v45  ;;  %v255_v46 = vld [vmem:[%s2690_s28 + $0xf9] sm:$0xff]  ;;  %v257_v50 = vld [vmem:[%s2690_s28 + $0x111] sm:$0xff] }
  0x31   : > { %320 = vrot.lane.b32.xlu1 %v2737_v10, %s2608_s29  ;;  %318 = vrot.lane.b32.xlu0 %v2740_v11, %s2608_s29  ;;  %227 = vst.msk [vmem:[#allocation2 + $0xc8] sm:$0xff] %vm201_vm0, %v2893_v44  ;;  %226 = vst.msk [vmem:[#allocation2 + $0xc0] sm:$0xff] %vm201_vm0, %v2896_v45  ;;  %v196_v48 = vld [vmem:[%s2690_s28 + $0x140] sm:$0xff]  ;;  %v195_v49 = vld [vmem:[%s2690_s28 + $0x138] sm:$0xff] }
  0x32   : > { %229 = vst.msk [vmem:[#allocation2 + $0xd8] sm:$0xff] %vm201_vm0, %v196_v48  ;;  %228 = vst.msk [vmem:[#allocation2 + $0xd0] sm:$0xff] %vm201_vm0, %v195_v49  ;;  %v256_v51 = vld [vmem:[%s2690_s28 + $0x109] sm:$0xff]  ;;  %v198_v52 = vld [vmem:[%s2690_s28 + $0x158] sm:$0xff] }
  0x33   : > { %v197_v53 = vld [vmem:[%s2690_s28 + $0x150] sm:$0xff]  ;;  %231 = vst.msk [vmem:[#allocation2 + $0xe8] sm:$0xff] %vm201_vm0, %v198_v52  ;;  %v258_v55 = vld [vmem:[%s2690_s28 + $0x121] sm:$0xff]  ;;  %v260_v59 = vld [vmem:[%s2690_s28 + $0x139] sm:$0xff] }
  0x34   : > { %230 = vst.msk [vmem:[#allocation2 + $0xe0] sm:$0xff] %vm201_vm0, %v197_v53  ;;  %v259_v54 = vld [vmem:[%s2690_s28 + $0x129] sm:$0xff]  ;;  %v261_v58 = vld [vmem:[%s2690_s28 + $0x141] sm:$0xff]  ;;  %v263_v60 = vld [vmem:[%s2690_s28 + $0x159] sm:$0xff] }
  0x35   : > { %324 = vrot.lane.b32.xlu1 %v2751_v14, %s2608_s29  ;;  %322 = vrot.lane.b32.xlu0 %v2754_v15, %s2608_s29  ;;  %v200_v56 = vld [vmem:[%s2690_s28 + $0x170] sm:$0xff]  ;;  %v199_v57 = vld [vmem:[%s2690_s28 + $0x168] sm:$0xff] }
  0x36   : > { %233 = vst.msk [vmem:[#allocation2 + $0xf8] sm:$0xff] %vm201_vm0, %v200_v56  ;;  %232 = vst.msk [vmem:[#allocation2 + $0xf0] sm:$0xff] %vm201_vm0, %v199_v57  ;;  %v262_v61 = vld [vmem:[%s2690_s28 + $0x151] sm:$0xff]  ;;  %v264_v63 = vld [vmem:[%s2690_s28 + $0x169] sm:$0xff] }
  0x37   : > { %v265_v62 = vld [vmem:[%s2690_s28 + $0x171] sm:$0xff]  ;;  %v427_v3 = vld [vmem:[%s2690_s28 + $0x2] sm:$0xff]  ;;  %v2948_v17 = vld [vmem:[%s2690_s28 + $0x1a] sm:$0xff] }
  0x38   : > { %v428_v1 = vld [vmem:[%s2690_s28 + $0xa] sm:$0xff]  ;;  %v2945_v13 = vld [vmem:[%s2690_s28 + $0x22] sm:$0xff]  ;;  %v2995_v52 = vld [vmem:[%s2690_s28 + $0x9a] sm:$0xff] }
  0x39   : > { %328 = vrot.lane.b32.xlu1 %v2766_v18, %s2608_s29  ;;  %326 = vrot.lane.b32.xlu0 %v2780_v21, %s2608_s29  ;;  %v2975_v48 = vld [vmem:[%s2690_s28 + $0x6a] sm:$0xff]  ;;  %v2978_v49 = vld [vmem:[%s2690_s28 + $0x62] sm:$0xff] }
  0x3a   : > { %v2998_v53 = vld [vmem:[%s2690_s28 + $0x92] sm:$0xff]  ;;  %v3015_v56 = vld [vmem:[%s2690_s28 + $0xca] sm:$0xff]  ;;  %v3018_v57 = vld [vmem:[%s2690_s28 + $0xc2] sm:$0xff] }
  0x3d   : > { %332 = vrot.lane.b32.xlu1 %v2816_v29, %s2608_s29  ;;  %330 = vrot.lane.b32.xlu0 %v2819_v30, %s2608_s29 }
  0x41   : > { %336 = vrot.lane.b32.xlu1 %v253_v42, %s2608_s29  ;;  %334 = vrot.lane.b32.xlu0 %v252_v43, %s2608_s29  ;;  %v2955_v42 = vld [vmem:[%s2690_s28 + $0x3a] sm:$0xff]  ;;  %v2958_v43 = vld [vmem:[%s2690_s28 + $0x32] sm:$0xff] }
  0x45   : > { %340 = vrot.lane.b32.xlu1 %v255_v46, %s2608_s29  ;;  %338 = vrot.lane.b32.xlu0 %v254_v47, %s2608_s29  ;;  %v2965_v46 = vld [vmem:[%s2690_s28 + $0x52] sm:$0xff]  ;;  %v2968_v47 = vld [vmem:[%s2690_s28 + $0x4a] sm:$0xff] }
  0x49   : > { %344 = vrot.lane.b32.xlu1 %v257_v50, %s2608_s29  ;;  %342 = vrot.lane.b32.xlu0 %v256_v51, %s2608_s29  ;;  %v2985_v50 = vld [vmem:[%s2690_s28 + $0x82] sm:$0xff]  ;;  %v2988_v51 = vld [vmem:[%s2690_s28 + $0x7a] sm:$0xff] }
  0x4d   : > { %348 = vrot.lane.b32.xlu1 %v259_v54, %s2608_s29  ;;  %346 = vrot.lane.b32.xlu0 %v258_v55, %s2608_s29  ;;  %v3005_v54 = vld [vmem:[%s2690_s28 + $0xb2] sm:$0xff]  ;;  %v3008_v55 = vld [vmem:[%s2690_s28 + $0xaa] sm:$0xff] }
  0x51   : > { %352 = vrot.lane.b32.xlu1 %v261_v58, %s2608_s29  ;;  %350 = vrot.lane.b32.xlu0 %v260_v59, %s2608_s29  ;;  %v446_v58 = vld [vmem:[%s2690_s28 + $0xe2] sm:$0xff]  ;;  %v445_v59 = vld [vmem:[%s2690_s28 + $0xda] sm:$0xff] }
  0x55   : > { %356 = vrot.lane.b32.xlu1 %v263_v60, %s2608_s29  ;;  %354 = vrot.lane.b32.xlu0 %v262_v61, %s2608_s29  ;;  %v448_v60 = vld [vmem:[%s2690_s28 + $0xfa] sm:$0xff]  ;;  %v447_v61 = vld [vmem:[%s2690_s28 + $0xf2] sm:$0xff] }
  0x59   : > { %360 = vrot.lane.b32.xlu1 %v265_v62, %s2608_s29  ;;  %358 = vrot.lane.b32.xlu0 %v264_v63, %s2608_s29  ;;  %v450_v62 = vld [vmem:[%s2690_s28 + $0x112] sm:$0xff]  ;;  %v449_v63 = vld [vmem:[%s2690_s28 + $0x10a] sm:$0xff]  ;;  %s162_s29 = scalar_lea.vmem [#allocation3], %s161_s27 }
  0x5d   : > { %493 = vrot.lane.b32.xlu1 %v428_v1, %s2609_s30  ;;  %491 = vrot.lane.b32.xlu0 %v427_v3, %s2609_s30  ;;  %v452_v1 = vld [vmem:[%s2690_s28 + $0x12a] sm:$0xff]  ;;  %v451_v3 = vld [vmem:[%s2690_s28 + $0x122] sm:$0xff] }
  0x61   : > { %497 = vrot.lane.b32.xlu1 %v2945_v13, %s2609_s30  ;;  %495 = vrot.lane.b32.xlu0 %v2948_v17, %s2609_s30 }
  0x65   : > { %501 = vrot.lane.b32.xlu1 %v2955_v42, %s2609_s30  ;;  %499 = vrot.lane.b32.xlu0 %v2958_v43, %s2609_s30 }
  0x69   : > { %505 = vrot.lane.b32.xlu1 %v2965_v46, %s2609_s30  ;;  %503 = vrot.lane.b32.xlu0 %v2968_v47, %s2609_s30 }
  0x6d   : > { %509 = vrot.lane.b32.xlu1 %v2975_v48, %s2609_s30  ;;  %507 = vrot.lane.b32.xlu0 %v2978_v49, %s2609_s30 }
  0x71   : > { %513 = vrot.lane.b32.xlu1 %v2985_v50, %s2609_s30  ;;  %511 = vrot.lane.b32.xlu0 %v2988_v51, %s2609_s30 }
  0x75   : > { %517 = vrot.lane.b32.xlu1 %v2995_v52, %s2609_s30  ;;  %515 = vrot.lane.b32.xlu0 %v2998_v53, %s2609_s30 }
  0x79   : > { %521 = vrot.lane.b32.xlu1 %v3005_v54, %s2609_s30  ;;  %519 = vrot.lane.b32.xlu0 %v3008_v55, %s2609_s30 }
  0x7d   : > { %525 = vrot.lane.b32.xlu1 %v3015_v56, %s2609_s30  ;;  %523 = vrot.lane.b32.xlu0 %v3018_v57, %s2609_s30 }
  0x81   : > { %529 = vrot.lane.b32.xlu1 %v446_v58, %s2609_s30  ;;  %527 = vrot.lane.b32.xlu0 %v445_v59, %s2609_s30  ;;  %v454_v58 = vld [vmem:[%s2690_s28 + $0x142] sm:$0xff]  ;;  %v453_v59 = vld [vmem:[%s2690_s28 + $0x13a] sm:$0xff] }
  0x85   : > { %533 = vrot.lane.b32.xlu1 %v448_v60, %s2609_s30  ;;  %531 = vrot.lane.b32.xlu0 %v447_v61, %s2609_s30 }
  0x89   : > { %537 = vrot.lane.b32.xlu1 %v450_v62, %s2609_s30  ;;  %535 = vrot.lane.b32.xlu0 %v449_v63, %s2609_s30  ;;  %v456_v62 = vld [vmem:[%s2690_s28 + $0x15a] sm:$0xff]  ;;  %v455_v63 = vld [vmem:[%s2690_s28 + $0x152] sm:$0xff] }
  0x8d   : > { %541 = vrot.lane.b32.xlu1 %v452_v1, %s2609_s30  ;;  %539 = vrot.lane.b32.xlu0 %v451_v3, %s2609_s30  ;;  %v458_v3 = vld [vmem:[%s2690_s28 + $0x172] sm:$0xff] }
  0x8f   : > { %v303_v60 = vpop.permute.xlu1 %302  ;;  %v299_v61 = vpop.permute.xlu0 %298 }
  0x90   : > { %397 = vst.msk [vmem:[#allocation2 + $0x10] sm:$0xff] %vm394_vm1, %v303_v60  ;;  %395 = vst.msk [vmem:[#allocation2] sm:$0xff] %vm394_vm1, %v299_v61  ;;  %v457_v60 = vld [vmem:[%s2690_s28 + $0x16a] sm:$0xff] }
  0x91   : > { %545 = vrot.lane.b32.xlu1 %v454_v58, %s2609_s30  ;;  %543 = vrot.lane.b32.xlu0 %v453_v59, %s2609_s30 }
  0x93   : > { %v305_v1 = vpop.permute.xlu1 %304  ;;  %v301_v45 = vpop.permute.xlu0 %300 }
  0x94   : > { %398 = vst.msk [vmem:[#allocation2 + $0x18] sm:$0xff] %vm394_vm1, %v305_v1  ;;  %396 = vst.msk [vmem:[#allocation2 + $0x8] sm:$0xff] %vm394_vm1, %v301_v45 }
  0x95   : > { %549 = vrot.lane.b32.xlu1 %v456_v62, %s2609_s30  ;;  %547 = vrot.lane.b32.xlu0 %v455_v63, %s2609_s30 }
  0x97   : > { %v309_v44 = vpop.permute.xlu1 %308  ;;  %v307_v61 = vpop.permute.xlu0 %306 }
  0x98   : > { %400 = vst.msk [vmem:[#allocation2 + $0x28] sm:$0xff] %vm394_vm1, %v309_v44  ;;  %399 = vst.msk [vmem:[#allocation2 + $0x20] sm:$0xff] %vm394_vm1, %v307_v61 }
  0x99   : > { %553 = vrot.lane.b32.xlu1 %v458_v3, %s2609_s30  ;;  %551 = vrot.lane.b32.xlu0 %v457_v60, %s2609_s30  ;;  %s2153_s30 = sshll.u32 %s162_s29, 4  ;;  %s3721_s30 = int_to_ptr.vmem [resolvable:$true] %s2153_s30 }
  0x9a   : > { %s2544_s8 = scalar_lea.vmem %s3721_s30, 16 }
  0x9b   : > { %v313_v58 = vpop.permute.xlu1 %312  ;;  %v311_v59 = vpop.permute.xlu0 %310  ;;  %p2545_p11 = scmp.ne.s32.totalorder %s3721_s30, %s2544_s8 }
  0x9c   : > { %402 = vst.msk [vmem:[#allocation2 + $0x38] sm:$0xff] %vm394_vm1, %v313_v58  ;;  %401 = vst.msk [vmem:[#allocation2 + $0x30] sm:$0xff] %vm394_vm1, %v311_v59 }
  0x9d   : > { %687 = vrot.lane.b32.xlu1 %v2760_v16, %s2610_s4  ;;  %685 = vrot.lane.b32.xlu0 %v2747_v12, %s2610_s4  ;;  %p2546_p12 = pnand %p2545_p11, %p2675_p5 }
  0x9f   : > { %v317_v44 = vpop.permute.xlu1 %316  ;;  %v315_v45 = vpop.permute.xlu0 %314  ;;  %p2547_p13 = pneg %p2546_p12 }
  0xa0   : > { %404 = vst.msk [vmem:[#allocation2 + $0x48] sm:$0xff] %vm394_vm1, %v317_v44  ;;  %403 = vst.msk [vmem:[#allocation2 + $0x40] sm:$0xff] %vm394_vm1, %v315_v45 }
  0xa1   : > { %691 = vrot.lane.b32.xlu1 %v2770_v19, %s2610_s4  ;;  %689 = vrot.lane.b32.xlu0 %v2773_v20, %s2610_s4 }
  0xa3   : > { %v321_v62 = vpop.permute.xlu1 %320  ;;  %v319_v63 = vpop.permute.xlu0 %318 }
  0xa4   : > { %406 = vst.msk [vmem:[#allocation2 + $0x58] sm:$0xff] %vm394_vm1, %v321_v62  ;;  %405 = vst.msk [vmem:[#allocation2 + $0x50] sm:$0xff] %vm394_vm1, %v319_v63  ;;  %v2541_v62 = vld [vmem:[%s3762_s1] sm:$0xff]   ;;  %v2542_v63 = vld [vmem:[%s3762_s1 + $0x8] sm:$0xff]  }
  0xa5   : > { %695 = vrot.lane.b32.xlu1 %v2787_v22, %s2610_s4  ;;  %693 = vrot.lane.b32.xlu0 %v2792_v23, %s2610_s4 }
  0xa6   : > { %2447 = vmatprep.subr.bf16.mxu0 %v2541_v62  ;;  %2485 = vmatprep.subr.bf16.mxu1 %v2541_v62 }
  0xa7   : > { %v325_v12 = vpop.permute.xlu1 %324  ;;  %v323_v16 = vpop.permute.xlu0 %322  ;;  %2448 = vmatpush3.bf16.msra.mxu0 %v2541_v62  ;;  %2488 = vmatpush3.bf16.msra.mxu1 %v2541_v62 }
  0xa8   : > { %408 = vst.msk [vmem:[#allocation2 + $0x68] sm:$0xff] %vm394_vm1, %v325_v12  ;;  %407 = vst.msk [vmem:[#allocation2 + $0x60] sm:$0xff] %vm394_vm1, %v323_v16  ;;  %2449 = vmatprep.subr.bf16.mxu0 %v2542_v63  ;;  %2486 = vmatprep.subr.bf16.mxu1 %v2542_v63  ;;  %v2543_v12 = vld [vmem:[%s3762_s1 + $0x10] ss:$0 sps:$4 sm:$0x33]  }
  0xa9   : > { %699 = vrot.lane.b32.xlu1 %v2795_v24, %s2610_s4  ;;  %697 = vrot.lane.b32.xlu0 %v2798_v25, %s2610_s4 }
  0xab   : > { %v329_v1 = vpop.permute.xlu1 %328  ;;  %v327_v3 = vpop.permute.xlu0 %326  ;;  %2450 = vmatpush3.bf16.msra.mxu0 %v2542_v63  ;;  %2489 = vmatpush3.bf16.msra.mxu1 %v2542_v63 }
  0xac   : > { %410 = vst.msk [vmem:[#allocation2 + $0x78] sm:$0xff] %vm394_vm1, %v329_v1  ;;  %409 = vst.msk [vmem:[#allocation2 + $0x70] sm:$0xff] %vm394_vm1, %v327_v3  ;;  %2491 = vmatprep.subr.msk.bf16.mxu0 %vm1904_vm2, %v2543_v12  ;;  %2492 = vmatprep.subr.msk.bf16.mxu1 %vm1904_vm2, %v2543_v12 }
  0xad   : > { %880 = vrot.lane.b32.xlu1 %v2700_v2, %s2611_s5  ;;  %878 = vrot.lane.b32.xlu0 %v2693_v0, %s2611_s5 }
  0xaf   : > { %v333_v60 = vpop.permute.xlu1 %332  ;;  %v331_v61 = vpop.permute.xlu0 %330 }
  0xb0   : > { %412 = vst.msk [vmem:[#allocation2 + $0x88] sm:$0xff] %vm394_vm1, %v333_v60  ;;  %411 = vst.msk [vmem:[#allocation2 + $0x80] sm:$0xff] %vm394_vm1, %v331_v61 }
  0xb1   : > { %884 = vrot.lane.b32.xlu1 %v2707_v4, %s2611_s5  ;;  %882 = vrot.lane.b32.xlu0 %v2710_v5, %s2611_s5 }
  0xb3   : > { %v337_v58 = vpop.permute.xlu1 %336  ;;  %v335_v59 = vpop.permute.xlu0 %334 }
  0xb4   : > { %414 = vst.msk [vmem:[#allocation2 + $0x98] sm:$0xff] %vm394_vm1, %v337_v58  ;;  %413 = vst.msk [vmem:[#allocation2 + $0x90] sm:$0xff] %vm394_vm1, %v335_v59 }
  0xb5   : > { %1073 = vrot.lane.b32.xlu1 %v2945_v13, %s2612_s6  ;;  %1071 = vrot.lane.b32.xlu0 %v2948_v17, %s2612_s6 }
  0xb7   : > { %v341_v0 = vpop.permute.xlu1 %340  ;;  %v339_v2 = vpop.permute.xlu0 %338 }
  0xb8   : > { %416 = vst.msk [vmem:[#allocation2 + $0xa8] sm:$0xff] %vm394_vm1, %v341_v0  ;;  %415 = vst.msk [vmem:[#allocation2 + $0xa0] sm:$0xff] %vm394_vm1, %v339_v2 }
  0xb9   : > { %1077 = vrot.lane.b32.xlu1 %v2955_v42, %s2612_s6  ;;  %1075 = vrot.lane.b32.xlu0 %v2958_v43, %s2612_s6 }
  0xbb   : > { %v345_v44 = vpop.permute.xlu1 %344  ;;  %v343_v45 = vpop.permute.xlu0 %342 }
  0xbc   : > { %418 = vst.msk [vmem:[#allocation2 + $0xb8] sm:$0xff] %vm394_vm1, %v345_v44  ;;  %417 = vst.msk [vmem:[#allocation2 + $0xb0] sm:$0xff] %vm394_vm1, %v343_v45 }
  0xbd   : > { %1267 = vrot.lane.b32.xlu1 %v2770_v19, %s2613_s7  ;;  %1265 = vrot.lane.b32.xlu0 %v2773_v20, %s2613_s7 }
  0xbf   : > { %v349_v13 = vpop.permute.xlu1 %348  ;;  %v347_v17 = vpop.permute.xlu0 %346 }
  0xc0   : > { %420 = vst.msk [vmem:[#allocation2 + $0xc8] sm:$0xff] %vm394_vm1, %v349_v13  ;;  %419 = vst.msk [vmem:[#allocation2 + $0xc0] sm:$0xff] %vm394_vm1, %v347_v17 }
  0xc1   : > { %1271 = vrot.lane.b32.xlu1 %v2787_v22, %s2613_s7  ;;  %1269 = vrot.lane.b32.xlu0 %v2792_v23, %s2613_s7 }
  0xc3   : > { %v353_v19 = vpop.permute.xlu1 %352  ;;  %v351_v20 = vpop.permute.xlu0 %350 }
  0xc4   : > { %422 = vst.msk [vmem:[#allocation2 + $0xd8] sm:$0xff] %vm394_vm1, %v353_v19  ;;  %421 = vst.msk [vmem:[#allocation2 + $0xd0] sm:$0xff] %vm394_vm1, %v351_v20 }
  0xc5   : > { %1460 = vrot.lane.b32.xlu1 %v2707_v4, %s2614_s17  ;;  %1458 = vrot.lane.b32.xlu0 %v2710_v5, %s2614_s17  ;;  %v1906_v4 = vsel %vm1904_vm2, %v2543_v12, 0 }
  0xc6   : > { %2452 = vmatpush3.bf16.msra.mxu0 %v1906_v4  ;;  %2490 = vmatpush3.bf16.msra.mxu1 %v1906_v4 }
  0xc7   : > { %v357_v22 = vpop.permute.xlu1 %356  ;;  %v355_v23 = vpop.permute.xlu0 %354 }
  0xc8   : > { %424 = vst.msk [vmem:[#allocation2 + $0xe8] sm:$0xff] %vm394_vm1, %v357_v22  ;;  %423 = vst.msk [vmem:[#allocation2 + $0xe0] sm:$0xff] %vm394_vm1, %v355_v23 }
  0xc9   : > { %1464 = vrot.lane.b32.xlu1 %v2717_v6, %s2614_s17  ;;  %1462 = vrot.lane.b32.xlu0 %v2720_v7, %s2614_s17 }
  0xcb   : > { %v361_v5 = vpop.permute.xlu1 %360  ;;  %v359_v16 = vpop.permute.xlu0 %358 }
  0xcc   : > { %426 = vst.msk [vmem:[#allocation2 + $0xf8] sm:$0xff] %vm394_vm1, %v361_v5  ;;  %425 = vst.msk [vmem:[#allocation2 + $0xf0] sm:$0xff] %vm394_vm1, %v359_v16 }
  0xcd   : > { %1653 = vrot.lane.b32.xlu1 %v2955_v42, %s2615_s24  ;;  %1651 = vrot.lane.b32.xlu0 %v2958_v43, %s2615_s24 }
  0xcf   : > { %v494_v1 = vpop.permute.xlu1 %493  ;;  %v492_v3 = vpop.permute.xlu0 %491 }
  0xd0   : > { %589 = vst.msk [vmem:[#allocation2 + $0x8] sm:$0xff] %vm587_vm3, %v494_v1  ;;  %588 = vst.msk [vmem:[#allocation2] sm:$0xff] %vm587_vm3, %v492_v3 }
  0xd1   : > { %1657 = vrot.lane.b32.xlu1 %v2965_v46, %s2615_s24  ;;  %1655 = vrot.lane.b32.xlu0 %v2968_v47, %s2615_s24 }
  0xd3   : > { %v498_v60 = vpop.permute.xlu1 %497  ;;  %v496_v61 = vpop.permute.xlu0 %495 }
  0xd4   : > { %591 = vst.msk [vmem:[#allocation2 + $0x18] sm:$0xff] %vm587_vm3, %v498_v60  ;;  %590 = vst.msk [vmem:[#allocation2 + $0x10] sm:$0xff] %vm587_vm3, %v496_v61 }
  0xd5   : > { %888 = vrot.lane.b32.xlu1 %v2717_v6, %s2611_s5  ;;  %886 = vrot.lane.b32.xlu0 %v2720_v7, %s2611_s5 }
  0xd7   : > { %v502_v42 = vpop.permute.xlu1 %501  ;;  %v500_v43 = vpop.permute.xlu0 %499 }
  0xd8   : > { %593 = vst.msk [vmem:[#allocation2 + $0x28] sm:$0xff] %vm587_vm3, %v502_v42  ;;  %592 = vst.msk [vmem:[#allocation2 + $0x20] sm:$0xff] %vm587_vm3, %v500_v43 }
  0xd9   : > { %892 = vrot.lane.b32.xlu1 %v2727_v8, %s2611_s5  ;;  %890 = vrot.lane.b32.xlu0 %v2730_v9, %s2611_s5 }
  0xdb   : > { %v506_v58 = vpop.permute.xlu1 %505  ;;  %v504_v59 = vpop.permute.xlu0 %503 }
  0xdc   : > { %595 = vst.msk [vmem:[#allocation2 + $0x38] sm:$0xff] %vm587_vm3, %v506_v58  ;;  %594 = vst.msk [vmem:[#allocation2 + $0x30] sm:$0xff] %vm587_vm3, %v504_v59 }
  0xdd   : > { %1081 = vrot.lane.b32.xlu1 %v2965_v46, %s2612_s6  ;;  %1079 = vrot.lane.b32.xlu0 %v2968_v47, %s2612_s6 }
  0xdf   : > { %v510_v6 = vpop.permute.xlu1 %509  ;;  %v508_v7 = vpop.permute.xlu0 %507 }
  0xe0   : > { %597 = vst.msk [vmem:[#allocation2 + $0x48] sm:$0xff] %vm587_vm3, %v510_v6  ;;  %596 = vst.msk [vmem:[#allocation2 + $0x40] sm:$0xff] %vm587_vm3, %v508_v7 }
  0xe1   : > { %1085 = vrot.lane.b32.xlu1 %v2975_v48, %s2612_s6  ;;  %1083 = vrot.lane.b32.xlu0 %v2978_v49, %s2612_s6 }
  0xe3   : > { %v514_v0 = vpop.permute.xlu1 %513  ;;  %v512_v2 = vpop.permute.xlu0 %511 }
  0xe4   : > { %599 = vst.msk [vmem:[#allocation2 + $0x58] sm:$0xff] %vm587_vm3, %v514_v0  ;;  %598 = vst.msk [vmem:[#allocation2 + $0x50] sm:$0xff] %vm587_vm3, %v512_v2 }
  0xe5   : > { %1275 = vrot.lane.b32.xlu1 %v2795_v24, %s2613_s7  ;;  %1273 = vrot.lane.b32.xlu0 %v2798_v25, %s2613_s7 }
  0xe7   : > { %v518_v46 = vpop.permute.xlu1 %517  ;;  %v516_v47 = vpop.permute.xlu0 %515 }
  0xe8   : > { %601 = vst.msk [vmem:[#allocation2 + $0x68] sm:$0xff] %vm587_vm3, %v518_v46  ;;  %600 = vst.msk [vmem:[#allocation2 + $0x60] sm:$0xff] %vm587_vm3, %v516_v47 }
  0xe9   : > { %1279 = vrot.lane.b32.xlu1 %v2807_v26, %s2613_s7  ;;  %1277 = vrot.lane.b32.xlu0 %v2810_v27, %s2613_s7 }
  0xeb   : > { %v522_v44 = vpop.permute.xlu1 %521  ;;  %v520_v45 = vpop.permute.xlu0 %519 }
  0xec   : > { %603 = vst.msk [vmem:[#allocation2 + $0x78] sm:$0xff] %vm587_vm3, %v522_v44  ;;  %602 = vst.msk [vmem:[#allocation2 + $0x70] sm:$0xff] %vm587_vm3, %v520_v45  ;;  %v2356_v44 = vld [vmem:[%s2690_s28 + $0xe1] sm:$0xff]  ;;  %v2355_v45 = vld [vmem:[%s2690_s28 + $0xd9] sm:$0xff] }
  0xed   : > { %1468 = vrot.lane.b32.xlu1 %v2727_v8, %s2614_s17  ;;  %1466 = vrot.lane.b32.xlu0 %v2730_v9, %s2614_s17 }
  0xef   : > { %v526_v24 = vpop.permute.xlu1 %525  ;;  %v524_v25 = vpop.permute.xlu0 %523 }
  0xf0   : > { %605 = vst.msk [vmem:[#allocation2 + $0x88] sm:$0xff] %vm587_vm3, %v526_v24  ;;  %604 = vst.msk [vmem:[#allocation2 + $0x80] sm:$0xff] %vm587_vm3, %v524_v25 }
  0xf1   : > { %1472 = vrot.lane.b32.xlu1 %v2737_v10, %s2614_s17  ;;  %1470 = vrot.lane.b32.xlu0 %v2740_v11, %s2614_s17 }
  0xf3   : > { %v530_v13 = vpop.permute.xlu1 %529  ;;  %v528_v17 = vpop.permute.xlu0 %527 }
  0xf4   : > { %607 = vst.msk [vmem:[#allocation2 + $0x98] sm:$0xff] %vm587_vm3, %v530_v13  ;;  %606 = vst.msk [vmem:[#allocation2 + $0x90] sm:$0xff] %vm587_vm3, %v528_v17  ;;  %v2386_v13 = vld [vmem:[%s2690_s28 + $0xca] sm:$0xff]  ;;  %v2385_v17 = vld [vmem:[%s2690_s28 + $0xc2] sm:$0xff] }
  0xf5   : > { %1661 = vrot.lane.b32.xlu1 %v2975_v48, %s2615_s24  ;;  %1659 = vrot.lane.b32.xlu0 %v2978_v49, %s2615_s24 }
  0xf7   : > { %v534_v8 = vpop.permute.xlu1 %533  ;;  %v532_v9 = vpop.permute.xlu0 %531 }
  0xf8   : > { %609 = vst.msk [vmem:[#allocation2 + $0xa8] sm:$0xff] %vm587_vm3, %v534_v8  ;;  %608 = vst.msk [vmem:[#allocation2 + $0xa0] sm:$0xff] %vm587_vm3, %v532_v9 }
  0xf9   : > { %1665 = vrot.lane.b32.xlu1 %v2985_v50, %s2615_s24  ;;  %1663 = vrot.lane.b32.xlu0 %v2988_v51, %s2615_s24 }
  0xfb   : > { %v538_v62 = vpop.permute.xlu1 %537  ;;  %v536_v19 = vpop.permute.xlu0 %535 }
  0xfc   : > { %611 = vst.msk [vmem:[#allocation2 + $0xb8] sm:$0xff] %vm587_vm3, %v538_v62  ;;  %610 = vst.msk [vmem:[#allocation2 + $0xb0] sm:$0xff] %vm587_vm3, %v536_v19  ;;  %v2388_v62 = vld [vmem:[%s2690_s28 + $0xe2] sm:$0xff]  ;;  %v2387_v19 = vld [vmem:[%s2690_s28 + $0xda] sm:$0xff] }
  0xfd   : > { %703 = vrot.lane.b32.xlu1 %v2807_v26, %s2610_s4  ;;  %701 = vrot.lane.b32.xlu0 %v2810_v27, %s2610_s4 }
  0xff   : > { %v542_v48 = vpop.permute.xlu1 %541  ;;  %v540_v49 = vpop.permute.xlu0 %539 }
 0x100   : > { %613 = vst.msk [vmem:[#allocation2 + $0xc8] sm:$0xff] %vm587_vm3, %v542_v48  ;;  %612 = vst.msk [vmem:[#allocation2 + $0xc0] sm:$0xff] %vm587_vm3, %v540_v49 }
 0x101   : > { %707 = vrot.lane.b32.xlu1 %v2813_v28, %s2610_s4  ;;  %705 = vrot.lane.b32.xlu0 %v2828_v31, %s2610_s4 }
 0x103   : > { %v546_v20 = vpop.permute.xlu1 %545  ;;  %v544_v63 = vpop.permute.xlu0 %543 }
 0x104   : > { %615 = vst.msk [vmem:[#allocation2 + $0xd8] sm:$0xff] %vm587_vm3, %v546_v20  ;;  %614 = vst.msk [vmem:[#allocation2 + $0xd0] sm:$0xff] %vm587_vm3, %v544_v63 }
 0x105   : > { %896 = vrot.lane.b32.xlu1 %v2737_v10, %s2611_s5  ;;  %894 = vrot.lane.b32.xlu0 %v2740_v11, %s2611_s5 }
 0x107   : > { %v550_v26 = vpop.permute.xlu1 %549  ;;  %v548_v27 = vpop.permute.xlu0 %547 }
 0x108   : > { %617 = vst.msk [vmem:[#allocation2 + $0xe8] sm:$0xff] %vm587_vm3, %v550_v26  ;;  %616 = vst.msk [vmem:[#allocation2 + $0xe0] sm:$0xff] %vm587_vm3, %v548_v27 }
 0x109   : > { %900 = vrot.lane.b32.xlu1 %v2751_v14, %s2611_s5  ;;  %898 = vrot.lane.b32.xlu0 %v2754_v15, %s2611_s5 }
 0x10b   : > { %v554_v22 = vpop.permute.xlu1 %553  ;;  %v552_v23 = vpop.permute.xlu0 %551 }
 0x10c   : > { %619 = vst.msk [vmem:[#allocation2 + $0xf8] sm:$0xff] %vm587_vm3, %v554_v22  ;;  %618 = vst.msk [vmem:[#allocation2 + $0xf0] sm:$0xff] %vm587_vm3, %v552_v23 }
 0x10d   : > { %1089 = vrot.lane.b32.xlu1 %v2985_v50, %s2612_s6  ;;  %1087 = vrot.lane.b32.xlu0 %v2988_v51, %s2612_s6 }
 0x10f   : > { %v688_v10 = vpop.permute.xlu1 %687  ;;  %v686_v11 = vpop.permute.xlu0 %685 }
 0x110   : > { %783 = vst.msk [vmem:[#allocation2 + $0x8] sm:$0xff] %vm781_vm4, %v688_v10  ;;  %782 = vst.msk [vmem:[#allocation2] sm:$0xff] %vm781_vm4, %v686_v11 }
 0x111   : > { %1093 = vrot.lane.b32.xlu1 %v2995_v52, %s2612_s6  ;;  %1091 = vrot.lane.b32.xlu0 %v2998_v53, %s2612_s6 }
 0x113   : > { %v692_v12 = vpop.permute.xlu1 %691  ;;  %v690_v4 = vpop.permute.xlu0 %689 }
 0x114   : > { %785 = vst.msk [vmem:[#allocation2 + $0x18] sm:$0xff] %vm781_vm4, %v692_v12  ;;  %784 = vst.msk [vmem:[#allocation2 + $0x10] sm:$0xff] %vm781_vm4, %v690_v4 }
 0x115   : > { %1283 = vrot.lane.b32.xlu1 %v2813_v28, %s2613_s7  ;;  %1281 = vrot.lane.b32.xlu0 %v2828_v31, %s2613_s7 }
 0x117   : > { %v696_v50 = vpop.permute.xlu1 %695  ;;  %v694_v51 = vpop.permute.xlu0 %693 }
 0x118   : > { %787 = vst.msk [vmem:[#allocation2 + $0x28] sm:$0xff] %vm781_vm4, %v696_v50  ;;  %786 = vst.msk [vmem:[#allocation2 + $0x20] sm:$0xff] %vm781_vm4, %v694_v51  ;;  %v2296_v50 = vld [vmem:[%s2690_s28 + $0xfa] sm:$0xff]  ;;  %v2295_v51 = vld [vmem:[%s2690_s28 + $0xf2] sm:$0xff] }
 0x119   : > { %1287 = vrot.lane.b32.xlu1 %v2831_v32, %s2613_s7  ;;  %1285 = vrot.lane.b32.xlu0 %v2834_v33, %s2613_s7 }
 0x11b   : > { %v700_v5 = vpop.permute.xlu1 %699  ;;  %v698_v16 = vpop.permute.xlu0 %697 }
 0x11c   : > { %789 = vst.msk [vmem:[#allocation2 + $0x38] sm:$0xff] %vm781_vm4, %v700_v5  ;;  %788 = vst.msk [vmem:[#allocation2 + $0x30] sm:$0xff] %vm781_vm4, %v698_v16 }
 0x11d   : > { %1476 = vrot.lane.b32.xlu1 %v2751_v14, %s2614_s17  ;;  %1474 = vrot.lane.b32.xlu0 %v2754_v15, %s2614_s17 }
 0x11f   : > { %v881_v28 = vpop.permute.xlu1 %880  ;;  %v879_v31 = vpop.permute.xlu0 %878 }
 0x120   : > { %976 = vst.msk [vmem:[#allocation2 + $0x8] sm:$0xff] %vm974_vm5, %v881_v28  ;;  %975 = vst.msk [vmem:[#allocation2] sm:$0xff] %vm974_vm5, %v879_v31 }
 0x121   : > { %1480 = vrot.lane.b32.xlu1 %v2766_v18, %s2614_s17  ;;  %1478 = vrot.lane.b32.xlu0 %v2780_v21, %s2614_s17 }
 0x123   : > { %v885_v1 = vpop.permute.xlu1 %884  ;;  %v883_v3 = vpop.permute.xlu0 %882 }
 0x124   : > { %978 = vst.msk [vmem:[#allocation2 + $0x18] sm:$0xff] %vm974_vm5, %v885_v1  ;;  %977 = vst.msk [vmem:[#allocation2 + $0x10] sm:$0xff] %vm974_vm5, %v883_v3 }
 0x125   : > { %1669 = vrot.lane.b32.xlu1 %v2995_v52, %s2615_s24  ;;  %1667 = vrot.lane.b32.xlu0 %v2998_v53, %s2615_s24 }
 0x127   : > { %v1074_v14 = vpop.permute.xlu1 %1073  ;;  %v1072_v15 = vpop.permute.xlu0 %1071 }
 0x128   : > { %1169 = vst.msk [vmem:[#allocation2 + $0x8] sm:$0xff] %vm1167_vm6, %v1074_v14  ;;  %1168 = vst.msk [vmem:[#allocation2] sm:$0xff] %vm1167_vm6, %v1072_v15 }
 0x129   : > { %1673 = vrot.lane.b32.xlu1 %v3005_v54, %s2615_s24  ;;  %1671 = vrot.lane.b32.xlu0 %v3008_v55, %s2615_s24 }
 0x12b   : > { %v1078_v60 = vpop.permute.xlu1 %1077  ;;  %v1076_v61 = vpop.permute.xlu0 %1075 }
 0x12c   : > { %1171 = vst.msk [vmem:[#allocation2 + $0x18] sm:$0xff] %vm1167_vm6, %v1078_v60  ;;  %1170 = vst.msk [vmem:[#allocation2 + $0x10] sm:$0xff] %vm1167_vm6, %v1076_v61 }
 0x12d   : > { %711 = vrot.lane.b32.xlu1 %v2831_v32, %s2610_s4  ;;  %709 = vrot.lane.b32.xlu0 %v2834_v33, %s2610_s4 }
 0x12f   : > { %v1268_v52 = vpop.permute.xlu1 %1267  ;;  %v1266_v53 = vpop.permute.xlu0 %1265 }
 0x130   : > { %1363 = vst.msk [vmem:[#allocation2 + $0x8] sm:$0xff] %vm1361_vm7, %v1268_v52  ;;  %1362 = vst.msk [vmem:[#allocation2] sm:$0xff] %vm1361_vm7, %v1266_v53 }
 0x131   : > { %715 = vrot.lane.b32.xlu1 %v2847_v34, %s2610_s4  ;;  %713 = vrot.lane.b32.xlu0 %v2850_v35, %s2610_s4 }
 0x133   : > { %v1272_v42 = vpop.permute.xlu1 %1271  ;;  %v1270_v43 = vpop.permute.xlu0 %1269 }
 0x134   : > { %1365 = vst.msk [vmem:[#allocation2 + $0x18] sm:$0xff] %vm1361_vm7, %v1272_v42  ;;  %1364 = vst.msk [vmem:[#allocation2 + $0x10] sm:$0xff] %vm1361_vm7, %v1270_v43  ;;  %v2359_v43 = vld [vmem:[%s2690_s28 + $0x109] sm:$0xff] }
 0x135   : > { %904 = vrot.lane.b32.xlu1 %v2766_v18, %s2611_s5  ;;  %902 = vrot.lane.b32.xlu0 %v2780_v21, %s2611_s5 }
 0x137   : > { %v1461_v32 = vpop.permute.xlu1 %1460  ;;  %v1459_v33 = vpop.permute.xlu0 %1458 }
 0x138   : > { %1556 = vst.msk [vmem:[#allocation2 + $0x8] sm:$0xff] %vm1554_vm8, %v1461_v32  ;;  %1555 = vst.msk [vmem:[#allocation2] sm:$0xff] %vm1554_vm8, %v1459_v33 }
 0x139   : > { %908 = vrot.lane.b32.xlu1 %v2816_v29, %s2611_s5  ;;  %906 = vrot.lane.b32.xlu0 %v2819_v30, %s2611_s5 }
 0x13b   : > { %v1465_v58 = vpop.permute.xlu1 %1464  ;;  %v1463_v59 = vpop.permute.xlu0 %1462 }
 0x13c   : > { %1558 = vst.msk [vmem:[#allocation2 + $0x18] sm:$0xff] %vm1554_vm8, %v1465_v58  ;;  %1557 = vst.msk [vmem:[#allocation2 + $0x10] sm:$0xff] %vm1554_vm8, %v1463_v59 }
 0x13d   : > { %1097 = vrot.lane.b32.xlu1 %v3005_v54, %s2612_s6  ;;  %1095 = vrot.lane.b32.xlu0 %v3008_v55, %s2612_s6 }
 0x13f   : > { %v1654_v18 = vpop.permute.xlu1 %1653  ;;  %v1652_v21 = vpop.permute.xlu0 %1651 }
 0x140   : > { %1749 = vst.msk [vmem:[#allocation2 + $0x8] sm:$0xff] %vm1747_vm9, %v1654_v18  ;;  %1748 = vst.msk [vmem:[#allocation2] sm:$0xff] %vm1747_vm9, %v1652_v21  ;;  %v2392_v18 = vld [vmem:[%s2690_s28 + $0x112] sm:$0xff]  ;;  %v2391_v21 = vld [vmem:[%s2690_s28 + $0x10a] sm:$0xff] }
 0x141   : > { %1101 = vrot.lane.b32.xlu1 %v3015_v56, %s2612_s6  ;;  %1099 = vrot.lane.b32.xlu0 %v3018_v57, %s2612_s6 }
 0x143   : > { %v1658_v29 = vpop.permute.xlu1 %1657  ;;  %v1656_v30 = vpop.permute.xlu0 %1655 }
 0x144   : > { %1751 = vst.msk [vmem:[#allocation2 + $0x18] sm:$0xff] %vm1747_vm9, %v1658_v29  ;;  %1750 = vst.msk [vmem:[#allocation2 + $0x10] sm:$0xff] %vm1747_vm9, %v1656_v30 }
 0x145   : > { %1291 = vrot.lane.b32.xlu1 %v2847_v34, %s2613_s7  ;;  %1289 = vrot.lane.b32.xlu0 %v2850_v35, %s2613_s7  ;;  %v2354_v34 = vld [vmem:[%s2690_s28 + $0xc9] sm:$0xff]  ;;  %v2353_v35 = vld [vmem:[%s2690_s28 + $0xc1] sm:$0xff] }
 0x147   : > { %v889_v54 = vpop.permute.xlu1 %888  ;;  %v887_v55 = vpop.permute.xlu0 %886  ;;  %v1780_v56 = vld [vmem:[#allocation2] sm:$0xff]  ;;  %v1781_v6 = vld [vmem:[#allocation2 + $0x8] sm:$0xff] }
 0x148   : > { %980 = vst.msk [vmem:[#allocation2 + $0x28] sm:$0xff] %vm974_vm5, %v889_v54  ;;  %979 = vst.msk [vmem:[#allocation2 + $0x20] sm:$0xff] %vm974_vm5, %v887_v55  ;;  %v1812_v57 = vpack.c.bf16 %v1781_v6, %v1780_v56 }
 0x149   : > { %1295 = vrot.lane.b32.xlu1 %v2857_v36, %s2613_s7  ;;  %1293 = vrot.lane.b32.xlu0 %v2860_v37, %s2613_s7 }
 0x14a   : > { %2453 = vmatprep.mubr.msk.bf16.mxu0 %vm1855_vm10, %v1812_v57  ;;  %v3771_v57 = vld [vmem:[#allocation6_spill] sm:$0xff] }
 0x14b   : > { %v893_v7 = vpop.permute.xlu1 %892  ;;  %v891_v0 = vpop.permute.xlu0 %890  ;;  %v1782_v2 = vld [vmem:[#allocation2 + $0x10] sm:$0xff]  ;;  %v1783_v46 = vld [vmem:[#allocation2 + $0x18] sm:$0xff] }
 0x14c   : > { %982 = vst.msk [vmem:[#allocation2 + $0x38] sm:$0xff] %vm974_vm5, %v893_v7  ;;  %981 = vst.msk [vmem:[#allocation2 + $0x30] sm:$0xff] %vm974_vm5, %v891_v0  ;;  %v1813_v47 = vpack.c.bf16 %v1783_v46, %v1782_v2 }
 0x14d   : > { %1484 = vrot.lane.b32.xlu1 %v2354_v34, %s2614_s17  ;;  %1482 = vrot.lane.b32.xlu0 %v2353_v35, %s2614_s17  ;;  %v3772_v34 = vld [vmem:[#allocation7_spill] sm:$0xff] }
 0x14e   : > { %2454 = vmatmul.mubr.msk.bf16.vlgmr.msra.gmra.mrb[0].mxu0 %vm1855_vm10, %v1813_v47 }
 0x14f   : > { %v1082_v24 = vpop.permute.xlu1 %1081  ;;  %v1080_v25 = vpop.permute.xlu0 %1079 }
 0x150   : > { %1173 = vst.msk [vmem:[#allocation2 + $0x28] sm:$0xff] %vm1167_vm6, %v1082_v24  ;;  %1172 = vst.msk [vmem:[#allocation2 + $0x20] sm:$0xff] %vm1167_vm6, %v1080_v25 }
 0x151   : > { %1488 = vrot.lane.b32.xlu1 %v2356_v44, %s2614_s17  ;;  %1486 = vrot.lane.b32.xlu0 %v2355_v45, %s2614_s17 }
 0x153   : > { %v1086_v8 = vpop.permute.xlu1 %1085  ;;  %v1084_v9 = vpop.permute.xlu0 %1083 }
 0x154   : > { %1175 = vst.msk [vmem:[#allocation2 + $0x38] sm:$0xff] %vm1167_vm6, %v1086_v8  ;;  %1174 = vst.msk [vmem:[#allocation2 + $0x30] sm:$0xff] %vm1167_vm6, %v1084_v9  ;;  %v2330_v9 = vld [vmem:[%s2690_s28 + $0x128] sm:$0xff] }
 0x155   : > { %1677 = vrot.lane.b32.xlu1 %v2386_v13, %s2615_s24  ;;  %1675 = vrot.lane.b32.xlu0 %v2385_v17, %s2615_s24 }
 0x157   : > { %v1276_v48 = vpop.permute.xlu1 %1275  ;;  %v1274_v49 = vpop.permute.xlu0 %1273 }
 0x158   : > { %1367 = vst.msk [vmem:[#allocation2 + $0x28] sm:$0xff] %vm1361_vm7, %v1276_v48  ;;  %1366 = vst.msk [vmem:[#allocation2 + $0x20] sm:$0xff] %vm1361_vm7, %v1274_v49 }
 0x159   : > { %1681 = vrot.lane.b32.xlu1 %v2388_v62, %s2615_s24  ;;  %1679 = vrot.lane.b32.xlu0 %v2387_v19, %s2615_s24 }
 0x15b   : > { %v1280_v20 = vpop.permute.xlu1 %1279  ;;  %v1278_v63 = vpop.permute.xlu0 %1277 }
 0x15c   : > { %1369 = vst.msk [vmem:[#allocation2 + $0x38] sm:$0xff] %vm1361_vm7, %v1280_v20  ;;  %1368 = vst.msk [vmem:[#allocation2 + $0x30] sm:$0xff] %vm1361_vm7, %v1278_v63 }
 0x15d   : > { %719 = vrot.lane.b32.xlu1 %v2857_v36, %s2610_s4  ;;  %717 = vrot.lane.b32.xlu0 %v2860_v37, %s2610_s4  ;;  %v2264_v36 = vld [vmem:[%s2690_s28 + $0xf9] sm:$0xff]  ;;  %v2263_v37 = vld [vmem:[%s2690_s28 + $0xf1] sm:$0xff] }
 0x15f   : > { %v1469_v26 = vpop.permute.xlu1 %1468  ;;  %v1467_v27 = vpop.permute.xlu0 %1466 }
 0x160   : > { %1560 = vst.msk [vmem:[#allocation2 + $0x28] sm:$0xff] %vm1554_vm8, %v1469_v26  ;;  %1559 = vst.msk [vmem:[#allocation2 + $0x20] sm:$0xff] %vm1554_vm8, %v1467_v27  ;;  %v2332_v26 = vld [vmem:[%s2690_s28 + $0x140] sm:$0xff]  ;;  %v2331_v27 = vld [vmem:[%s2690_s28 + $0x138] sm:$0xff] }
 0x161   : > { %723 = vrot.lane.b32.xlu1 %v2863_v38, %s2610_s4  ;;  %721 = vrot.lane.b32.xlu0 %v2872_v39, %s2610_s4 }
 0x163   : > { %v1473_v22 = vpop.permute.xlu1 %1472  ;;  %v1471_v23 = vpop.permute.xlu0 %1470 }
 0x164   : > { %1562 = vst.msk [vmem:[#allocation2 + $0x38] sm:$0xff] %vm1554_vm8, %v1473_v22  ;;  %1561 = vst.msk [vmem:[#allocation2 + $0x30] sm:$0xff] %vm1554_vm8, %v1471_v23 }
 0x165   : > { %912 = vrot.lane.b32.xlu1 %v2356_v44, %s2611_s5  ;;  %910 = vrot.lane.b32.xlu0 %v2355_v45, %s2611_s5  ;;  %v2300_v44 = vld [vmem:[%s2690_s28 + $0x12a] sm:$0xff]  ;;  %v2299_v45 = vld [vmem:[%s2690_s28 + $0x122] sm:$0xff] }
 0x167   : > { %v1662_v10 = vpop.permute.xlu1 %1661  ;;  %v1660_v11 = vpop.permute.xlu0 %1659 }
 0x168   : > { %1753 = vst.msk [vmem:[#allocation2 + $0x28] sm:$0xff] %vm1747_vm9, %v1662_v10  ;;  %1752 = vst.msk [vmem:[#allocation2 + $0x20] sm:$0xff] %vm1747_vm9, %v1660_v11  ;;  %v2364_v10 = vld [vmem:[%s2690_s28 + $0x141] sm:$0xff]  ;;  %v2363_v11 = vld [vmem:[%s2690_s28 + $0x139] sm:$0xff] }
 0x169   : > { %916 = vrot.lane.b32.xlu1 %v2264_v36, %s2611_s5  ;;  %914 = vrot.lane.b32.xlu0 %v2263_v37, %s2611_s5 }
 0x16b   : > { %v1666_v12 = vpop.permute.xlu1 %1665  ;;  %v1664_v4 = vpop.permute.xlu0 %1663 }
 0x16c   : > { %1755 = vst.msk [vmem:[#allocation2 + $0x38] sm:$0xff] %vm1747_vm9, %v1666_v12  ;;  %1754 = vst.msk [vmem:[#allocation2 + $0x30] sm:$0xff] %vm1747_vm9, %v1664_v4 }
 0x16d   : > { %1105 = vrot.lane.b32.xlu1 %v2388_v62, %s2612_s6  ;;  %1103 = vrot.lane.b32.xlu0 %v2387_v19, %s2612_s6  ;;  %v2329_v62 = vld [vmem:[%s2690_s28 + $0x120] sm:$0xff] }
 0x16f   : > { %v704_v5 = vpop.permute.xlu1 %703  ;;  %v702_v16 = vpop.permute.xlu0 %701  ;;  %v1784_v28 = vld [vmem:[#allocation2 + $0x20] sm:$0xff]  ;;  %v1785_v31 = vld [vmem:[#allocation2 + $0x28] sm:$0xff] }
 0x170   : > { %791 = vst.msk [vmem:[#allocation2 + $0x48] sm:$0xff] %vm781_vm4, %v704_v5  ;;  %790 = vst.msk [vmem:[#allocation2 + $0x40] sm:$0xff] %vm781_vm4, %v702_v16  ;;  %v1814_v1 = vpack.c.bf16 %v1785_v31, %v1784_v28  ;;  %v2396_v5 = vld [vmem:[%s2690_s28 + $0x142] sm:$0xff]  ;;  %v2395_v16 = vld [vmem:[%s2690_s28 + $0x13a] sm:$0xff] }
 0x171   : > { %1109 = vrot.lane.b32.xlu1 %v2296_v50, %s2612_s6  ;;  %1107 = vrot.lane.b32.xlu0 %v2295_v51, %s2612_s6 }
 0x172   : > { %2457 = vmatprep.mubr.msk.bf16.mxu0 %vm1855_vm10, %v1814_v1 }
 0x173   : > { %v708_v3 = vpop.permute.xlu1 %707  ;;  %v706_v14 = vpop.permute.xlu0 %705  ;;  %v1786_v15 = vld [vmem:[#allocation2 + $0x30] sm:$0xff]  ;;  %v1787_v60 = vld [vmem:[#allocation2 + $0x38] sm:$0xff] }
 0x174   : > { %793 = vst.msk [vmem:[#allocation2 + $0x58] sm:$0xff] %vm781_vm4, %v708_v3  ;;  %792 = vst.msk [vmem:[#allocation2 + $0x50] sm:$0xff] %vm781_vm4, %v706_v14  ;;  %v1815_v61 = vpack.c.bf16 %v1787_v60, %v1786_v15  ;;  %v2240_v14 = vld [vmem:[%s2690_s28 + $0x158] sm:$0xff]  ;;  %v2239_v15 = vld [vmem:[%s2690_s28 + $0x150] sm:$0xff] }
 0x175   : > { %1299 = vrot.lane.b32.xlu1 %v2863_v38, %s2613_s7  ;;  %1297 = vrot.lane.b32.xlu0 %v2872_v39, %s2613_s7  ;;  %v2360_v39 = vld [vmem:[%s2690_s28 + $0x111] sm:$0xff] }
 0x176   : > { %2458 = vmatmul.mubr.msk.bf16.gmra.mrb[4].mxu0 %vm1855_vm10, %v1815_v61 }
 0x177   : > { %v897_v52 = vpop.permute.xlu1 %896  ;;  %v895_v53 = vpop.permute.xlu0 %894 }
 0x178   : > { %984 = vst.msk [vmem:[#allocation2 + $0x48] sm:$0xff] %vm974_vm5, %v897_v52  ;;  %983 = vst.msk [vmem:[#allocation2 + $0x40] sm:$0xff] %vm974_vm5, %v895_v53 }
 0x179   : > { %1303 = vrot.lane.b32.xlu1 %v2875_v40, %s2613_s7  ;;  %1301 = vrot.lane.b32.xlu0 %v2878_v41, %s2613_s7 }
 0x17b   : > { %v901_v42 = vpop.permute.xlu1 %900  ;;  %v899_v38 = vpop.permute.xlu0 %898 }
 0x17c   : > { %986 = vst.msk [vmem:[#allocation2 + $0x58] sm:$0xff] %vm974_vm5, %v901_v42  ;;  %985 = vst.msk [vmem:[#allocation2 + $0x50] sm:$0xff] %vm974_vm5, %v899_v38  ;;  %v2272_v42 = vld [vmem:[%s2690_s28 + $0x159] sm:$0xff]  ;;  %v2271_v38 = vld [vmem:[%s2690_s28 + $0x151] sm:$0xff] }
 0x17d   : > { %1492 = vrot.lane.b32.xlu1 %v2264_v36, %s2614_s17  ;;  %1490 = vrot.lane.b32.xlu0 %v2263_v37, %s2614_s17 }
 0x17f   : > { %v1090_v32 = vpop.permute.xlu1 %1089  ;;  %v1088_v33 = vpop.permute.xlu0 %1087 }
 0x180   : > { %1177 = vst.msk [vmem:[#allocation2 + $0x48] sm:$0xff] %vm1167_vm6, %v1090_v32  ;;  %1176 = vst.msk [vmem:[#allocation2 + $0x40] sm:$0xff] %vm1167_vm6, %v1088_v33 }
 0x181   : > { %1496 = vrot.lane.b32.xlu1 %v2360_v39, %s2614_s17  ;;  %1494 = vrot.lane.b32.xlu0 %v2359_v43, %s2614_s17 }
 0x183   : > { %v1094_v58 = vpop.permute.xlu1 %1093  ;;  %v1092_v59 = vpop.permute.xlu0 %1091 }
 0x184   : > { %1179 = vst.msk [vmem:[#allocation2 + $0x58] sm:$0xff] %vm1167_vm6, %v1094_v58  ;;  %1178 = vst.msk [vmem:[#allocation2 + $0x50] sm:$0xff] %vm1167_vm6, %v1092_v59  ;;  %v2304_v58 = vld [vmem:[%s2690_s28 + $0x15a] sm:$0xff]  ;;  %v2303_v59 = vld [vmem:[%s2690_s28 + $0x152] sm:$0xff] }
 0x185   : > { %1685 = vrot.lane.b32.xlu1 %v2296_v50, %s2615_s24  ;;  %1683 = vrot.lane.b32.xlu0 %v2295_v51, %s2615_s24 }
 0x187   : > { %v1284_v29 = vpop.permute.xlu1 %1283  ;;  %v1282_v30 = vpop.permute.xlu0 %1281 }
 0x188   : > { %1371 = vst.msk [vmem:[#allocation2 + $0x48] sm:$0xff] %vm1361_vm7, %v1284_v29  ;;  %1370 = vst.msk [vmem:[#allocation2 + $0x40] sm:$0xff] %vm1361_vm7, %v1282_v30 }
 0x189   : > { %1689 = vrot.lane.b32.xlu1 %v2392_v18, %s2615_s24  ;;  %1687 = vrot.lane.b32.xlu0 %v2391_v21, %s2615_s24 }
 0x18b   : > { %v1288_v54 = vpop.permute.xlu1 %1287  ;;  %v1286_v55 = vpop.permute.xlu0 %1285 }
 0x18c   : > { %1373 = vst.msk [vmem:[#allocation2 + $0x58] sm:$0xff] %vm1361_vm7, %v1288_v54  ;;  %1372 = vst.msk [vmem:[#allocation2 + $0x50] sm:$0xff] %vm1361_vm7, %v1286_v55 }
 0x18d   : > { %727 = vrot.lane.b32.xlu1 %v2875_v40, %s2610_s4  ;;  %725 = vrot.lane.b32.xlu0 %v2878_v41, %s2610_s4  ;;  %v2268_v40 = vld [vmem:[%s2690_s28 + $0x129] sm:$0xff]  ;;  %v2267_v41 = vld [vmem:[%s2690_s28 + $0x121] sm:$0xff] }
 0x18f   : > { %v1477_v56 = vpop.permute.xlu1 %1476  ;;  %v1475_v6 = vpop.permute.xlu0 %1474 }
 0x190   : > { %1564 = vst.msk [vmem:[#allocation2 + $0x48] sm:$0xff] %vm1554_vm8, %v1477_v56  ;;  %1563 = vst.msk [vmem:[#allocation2 + $0x40] sm:$0xff] %vm1554_vm8, %v1475_v6 }
 0x191   : > { %731 = vrot.lane.b32.xlu1 %v3771_v57, %s2610_s4  ;;  %729 = vrot.lane.b32.xlu0 %v3772_v34, %s2610_s4 }
 0x193   : > { %v1481_v35 = vpop.permute.xlu1 %1480  ;;  %v1479_v7 = vpop.permute.xlu0 %1478 }
 0x194   : > { %1566 = vst.msk [vmem:[#allocation2 + $0x58] sm:$0xff] %vm1554_vm8, %v1481_v35  ;;  %1565 = vst.msk [vmem:[#allocation2 + $0x50] sm:$0xff] %vm1554_vm8, %v1479_v7  ;;  %v2336_v35 = vld [vmem:[%s2690_s28 + $0x170] sm:$0xff]  ;;  %v2335_v7 = vld [vmem:[%s2690_s28 + $0x168] sm:$0xff] }
 0x195   : > { %920 = vrot.lane.b32.xlu1 %v2360_v39, %s2611_s5  ;;  %918 = vrot.lane.b32.xlu0 %v2359_v43, %s2611_s5 }
 0x197   : > { %v1670_v0 = vpop.permute.xlu1 %1669  ;;  %v1668_v2 = vpop.permute.xlu0 %1667 }
 0x198   : > { %1757 = vst.msk [vmem:[#allocation2 + $0x48] sm:$0xff] %vm1747_vm9, %v1670_v0  ;;  %1756 = vst.msk [vmem:[#allocation2 + $0x40] sm:$0xff] %vm1747_vm9, %v1668_v2 }
 0x199   : > { %924 = vrot.lane.b32.xlu1 %v2268_v40, %s2611_s5  ;;  %922 = vrot.lane.b32.xlu0 %v2267_v41, %s2611_s5 }
 0x19b   : > { %v1674_v46 = vpop.permute.xlu1 %1673  ;;  %v1672_v47 = vpop.permute.xlu0 %1671 }
 0x19c   : > { %1759 = vst.msk [vmem:[#allocation2 + $0x58] sm:$0xff] %vm1747_vm9, %v1674_v46  ;;  %1758 = vst.msk [vmem:[#allocation2 + $0x50] sm:$0xff] %vm1747_vm9, %v1672_v47  ;;  %v2368_v46 = vld [vmem:[%s2690_s28 + $0x171] sm:$0xff]  ;;  %v2367_v47 = vld [vmem:[%s2690_s28 + $0x169] sm:$0xff] }
 0x19d   : > { %1113 = vrot.lane.b32.xlu1 %v2392_v18, %s2612_s6  ;;  %1111 = vrot.lane.b32.xlu0 %v2391_v21, %s2612_s6 }
 0x19f   : > { %v712_v24 = vpop.permute.xlu1 %711  ;;  %v710_v25 = vpop.permute.xlu0 %709  ;;  %v1788_v13 = vld [vmem:[#allocation2 + $0x40] sm:$0xff]  ;;  %v1789_v17 = vld [vmem:[#allocation2 + $0x48] sm:$0xff] }
 0x1a0   : > { %795 = vst.msk [vmem:[#allocation2 + $0x68] sm:$0xff] %vm781_vm4, %v712_v24  ;;  %794 = vst.msk [vmem:[#allocation2 + $0x60] sm:$0xff] %vm781_vm4, %v710_v25  ;;  %v1816_v8 = vpack.c.bf16 %v1789_v17, %v1788_v13  ;;  %v2400_v13 = vld [vmem:[%s2690_s28 + $0x172] sm:$0xff]  ;;  %v2399_v17 = vld [vmem:[%s2690_s28 + $0x16a] sm:$0xff] }
 0x1a1   : > { %1117 = vrot.lane.b32.xlu1 %v2300_v44, %s2612_s6  ;;  %1115 = vrot.lane.b32.xlu0 %v2299_v45, %s2612_s6 }
 0x1a2   : > { %2461 = vmatprep.mubr.msk.bf16.mxu0 %vm1855_vm10, %v1816_v8 }
 0x1a3   : > { %v716_v19 = vpop.permute.xlu1 %715  ;;  %v714_v48 = vpop.permute.xlu0 %713  ;;  %v1790_v49 = vld [vmem:[#allocation2 + $0x50] sm:$0xff]  ;;  %v1791_v20 = vld [vmem:[#allocation2 + $0x58] sm:$0xff] }
 0x1a4   : > { %797 = vst.msk [vmem:[#allocation2 + $0x78] sm:$0xff] %vm781_vm4, %v716_v19  ;;  %796 = vst.msk [vmem:[#allocation2 + $0x70] sm:$0xff] %vm781_vm4, %v714_v48  ;;  %v1817_v63 = vpack.c.bf16 %v1791_v20, %v1790_v49  ;;  %v2244_v48 = vld [vmem:[%s2690_s28 + $0x188] sm:$0xff]  ;;  %v2243_v49 = vld [vmem:[%s2690_s28 + $0x180] sm:$0xff] }
 0x1a5   : > { %1307 = vrot.lane.b32.xlu1 %v2330_v9, %s2613_s7  ;;  %1305 = vrot.lane.b32.xlu0 %v2329_v62, %s2613_s7 }
 0x1a6   : > { %2462 = vmatmul.mubr.msk.bf16.gmra.mrb[8].mxu0 %vm1855_vm10, %v1817_v63 }
 0x1a7   : > { %v905_v22 = vpop.permute.xlu1 %904  ;;  %v903_v23 = vpop.permute.xlu0 %902 }
 0x1a8   : > { %988 = vst.msk [vmem:[#allocation2 + $0x68] sm:$0xff] %vm974_vm5, %v905_v22  ;;  %987 = vst.msk [vmem:[#allocation2 + $0x60] sm:$0xff] %vm974_vm5, %v903_v23  ;;  %v2276_v22 = vld [vmem:[%s2690_s28 + $0x189] sm:$0xff]  ;;  %v2275_v23 = vld [vmem:[%s2690_s28 + $0x181] sm:$0xff] }
 0x1a9   : > { %1311 = vrot.lane.b32.xlu1 %v2332_v26, %s2613_s7  ;;  %1309 = vrot.lane.b32.xlu0 %v2331_v27, %s2613_s7 }
 0x1ab   : > { %v909_v36 = vpop.permute.xlu1 %908  ;;  %v907_v37 = vpop.permute.xlu0 %906 }
 0x1ac   : > { %990 = vst.msk [vmem:[#allocation2 + $0x78] sm:$0xff] %vm974_vm5, %v909_v36  ;;  %989 = vst.msk [vmem:[#allocation2 + $0x70] sm:$0xff] %vm974_vm5, %v907_v37 }
 0x1ad   : > { %1500 = vrot.lane.b32.xlu1 %v2268_v40, %s2614_s17  ;;  %1498 = vrot.lane.b32.xlu0 %v2267_v41, %s2614_s17 }
 0x1af   : > { %v1098_v12 = vpop.permute.xlu1 %1097  ;;  %v1096_v4 = vpop.permute.xlu0 %1095 }
 0x1b0   : > { %1181 = vst.msk [vmem:[#allocation2 + $0x68] sm:$0xff] %vm1167_vm6, %v1098_v12  ;;  %1180 = vst.msk [vmem:[#allocation2 + $0x60] sm:$0xff] %vm1167_vm6, %v1096_v4  ;;  %v2308_v12 = vld [vmem:[%s2690_s28 + $0x18a] sm:$0xff]  ;;  %v2307_v4 = vld [vmem:[%s2690_s28 + $0x182] sm:$0xff] }
 0x1b1   : > { %1504 = vrot.lane.b32.xlu1 %v2364_v10, %s2614_s17  ;;  %1502 = vrot.lane.b32.xlu0 %v2363_v11, %s2614_s17 }
 0x1b3   : > { %v1102_v50 = vpop.permute.xlu1 %1101  ;;  %v1100_v51 = vpop.permute.xlu0 %1099 }
 0x1b4   : > { %1183 = vst.msk [vmem:[#allocation2 + $0x78] sm:$0xff] %vm1167_vm6, %v1102_v50  ;;  %1182 = vst.msk [vmem:[#allocation2 + $0x70] sm:$0xff] %vm1167_vm6, %v1100_v51 }
 0x1b5   : > { %1693 = vrot.lane.b32.xlu1 %v2300_v44, %s2615_s24  ;;  %1691 = vrot.lane.b32.xlu0 %v2299_v45, %s2615_s24 }
 0x1b7   : > { %v1292_v28 = vpop.permute.xlu1 %1291  ;;  %v1290_v31 = vpop.permute.xlu0 %1289 }
 0x1b8   : > { %1375 = vst.msk [vmem:[#allocation2 + $0x68] sm:$0xff] %vm1361_vm7, %v1292_v28  ;;  %1374 = vst.msk [vmem:[#allocation2 + $0x60] sm:$0xff] %vm1361_vm7, %v1290_v31 }
 0x1b9   : > { %1697 = vrot.lane.b32.xlu1 %v2396_v5, %s2615_s24  ;;  %1695 = vrot.lane.b32.xlu0 %v2395_v16, %s2615_s24 }
 0x1bb   : > { %v1296_v1 = vpop.permute.xlu1 %1295  ;;  %v1294_v3 = vpop.permute.xlu0 %1293 }
 0x1bc   : > { %1377 = vst.msk [vmem:[#allocation2 + $0x78] sm:$0xff] %vm1361_vm7, %v1296_v1  ;;  %1376 = vst.msk [vmem:[#allocation2 + $0x70] sm:$0xff] %vm1361_vm7, %v1294_v3 }
 0x1bd   : > { %735 = vrot.lane.b32.xlu1 %v2332_v26, %s2610_s4  ;;  %733 = vrot.lane.b32.xlu0 %v2331_v27, %s2610_s4 }
 0x1bf   : > { %v1485_v60 = vpop.permute.xlu1 %1484  ;;  %v1483_v61 = vpop.permute.xlu0 %1482 }
 0x1c0   : > { %1568 = vst.msk [vmem:[#allocation2 + $0x68] sm:$0xff] %vm1554_vm8, %v1485_v60  ;;  %1567 = vst.msk [vmem:[#allocation2 + $0x60] sm:$0xff] %vm1554_vm8, %v1483_v61  ;;  %v2340_v60 = vld [vmem:[%s2690_s28 + $0x1a0] sm:$0xff]  ;;  %v2339_v61 = vld [vmem:[%s2690_s28 + $0x198] sm:$0xff] }
 0x1c1   : > { %739 = vrot.lane.b32.xlu1 %v2240_v14, %s2610_s4  ;;  %737 = vrot.lane.b32.xlu0 %v2239_v15, %s2610_s4 }
 0x1c3   : > { %v1489_v52 = vpop.permute.xlu1 %1488  ;;  %v1487_v53 = vpop.permute.xlu0 %1486 }
 0x1c4   : > { %1570 = vst.msk [vmem:[#allocation2 + $0x78] sm:$0xff] %vm1554_vm8, %v1489_v52  ;;  %1569 = vst.msk [vmem:[#allocation2 + $0x70] sm:$0xff] %vm1554_vm8, %v1487_v53 }
 0x1c5   : > { %928 = vrot.lane.b32.xlu1 %v2364_v10, %s2611_s5  ;;  %926 = vrot.lane.b32.xlu0 %v2363_v11, %s2611_s5 }
 0x1c7   : > { %v1678_v39 = vpop.permute.xlu1 %1677  ;;  %v1676_v43 = vpop.permute.xlu0 %1675 }
 0x1c8   : > { %1761 = vst.msk [vmem:[#allocation2 + $0x68] sm:$0xff] %vm1747_vm9, %v1678_v39  ;;  %1760 = vst.msk [vmem:[#allocation2 + $0x60] sm:$0xff] %vm1747_vm9, %v1676_v43  ;;  %v2372_v39 = vld [vmem:[%s2690_s28 + $0x1a1] sm:$0xff]  ;;  %v2371_v43 = vld [vmem:[%s2690_s28 + $0x199] sm:$0xff] }
 0x1c9   : > { %932 = vrot.lane.b32.xlu1 %v2272_v42, %s2611_s5  ;;  %930 = vrot.lane.b32.xlu0 %v2271_v38, %s2611_s5 }
 0x1cb   : > { %v1682_v32 = vpop.permute.xlu1 %1681  ;;  %v1680_v33 = vpop.permute.xlu0 %1679 }
 0x1cc   : > { %1763 = vst.msk [vmem:[#allocation2 + $0x78] sm:$0xff] %vm1747_vm9, %v1682_v32  ;;  %1762 = vst.msk [vmem:[#allocation2 + $0x70] sm:$0xff] %vm1747_vm9, %v1680_v33 }
 0x1cd   : > { %1121 = vrot.lane.b32.xlu1 %v2396_v5, %s2612_s6  ;;  %1119 = vrot.lane.b32.xlu0 %v2395_v16, %s2612_s6 }
 0x1cf   : > { %v720_v18 = vpop.permute.xlu1 %719  ;;  %v718_v21 = vpop.permute.xlu0 %717  ;;  %v1792_v29 = vld [vmem:[#allocation2 + $0x60] sm:$0xff]  ;;  %v1793_v30 = vld [vmem:[#allocation2 + $0x68] sm:$0xff] }
 0x1d0   : > { %799 = vst.msk [vmem:[#allocation2 + $0x88] sm:$0xff] %vm781_vm4, %v720_v18  ;;  %798 = vst.msk [vmem:[#allocation2 + $0x80] sm:$0xff] %vm781_vm4, %v718_v21  ;;  %v1818_v54 = vpack.c.bf16 %v1793_v30, %v1792_v29  ;;  %v2404_v18 = vld [vmem:[%s2690_s28 + $0x1a2] sm:$0xff]  ;;  %v2403_v21 = vld [vmem:[%s2690_s28 + $0x19a] sm:$0xff]  ;;  %s2425_s28 = sshll.u32 %s2658_s16, 4  ;;  %s2616_s16 = smov [#allocation3]  }
 0x1d1   : > { %1125 = vrot.lane.b32.xlu1 %v2304_v58, %s2612_s6  ;;  %1123 = vrot.lane.b32.xlu0 %v2303_v59, %s2612_s6  ;;  %s2548_s9 = sshll.u32 %s2616_s16, 4  ;;  %s2549_s9 = int_to_ptr.vmem [resolvable:$false] %s2548_s9 }
 0x1d2   : > { %2465 = vmatprep.mubr.msk.bf16.mxu0 %vm1855_vm10, %v1818_v54  ;;  %s2550_s10 = scalar_lea.vmem %s2549_s9, 32  ;;  %p2551_p0 = scmp.lt.s32.totalorder %s3721_s30, %s2549_s9 }
 0x1d3   : > { %v724_v55 = vpop.permute.xlu1 %723  ;;  %v722_v56 = vpop.permute.xlu0 %721  ;;  %v1794_v6 = vld [vmem:[#allocation2 + $0x70] sm:$0xff]  ;;  %v1795_v57 = vld [vmem:[#allocation2 + $0x78] sm:$0xff]  ;;  %p2552_p1 = scmp.lt.s32.totalorder %s2550_s10, %s2544_s8 }
 0x1d4   : > { %801 = vst.msk [vmem:[#allocation2 + $0x98] sm:$0xff] %vm781_vm4, %v724_v55  ;;  %800 = vst.msk [vmem:[#allocation2 + $0x90] sm:$0xff] %vm781_vm4, %v722_v56  ;;  %v1819_v34 = vpack.c.bf16 %v1795_v57, %v1794_v6 }
 0x1d5   : > { %1315 = vrot.lane.b32.xlu1 %v2240_v14, %s2613_s7  ;;  %1313 = vrot.lane.b32.xlu0 %v2239_v15, %s2613_s7  ;;  %p2553_p2 = por %p2552_p1, %p2551_p0 }
 0x1d6   : > { %2466 = vmatmul.mubr.msk.bf16.gmra.mrb[12].mxu0 %vm1855_vm10, %v1819_v34  ;;  %v3620_v34 = vld [vmem:[%s3763_s2] ss:$0 sm:$0xff] }
 0x1d7   : > { %v913_v40 = vpop.permute.xlu1 %912  ;;  %v911_v41 = vpop.permute.xlu0 %910  ;;  %p2554_p3 = pnand %p2553_p2, %p2547_p13 }
 0x1d8   : > { %992 = vst.msk [vmem:[#allocation2 + $0x88] sm:$0xff] %vm974_vm5, %v913_v40  ;;  %991 = vst.msk [vmem:[#allocation2 + $0x80] sm:$0xff] %vm974_vm5, %v911_v41 }
 0x1d9   : > { %1319 = vrot.lane.b32.xlu1 %v2336_v35, %s2613_s7  ;;  %1317 = vrot.lane.b32.xlu0 %v2335_v7, %s2613_s7 }
 0x1db   : > { %v917_v0 = vpop.permute.xlu1 %916  ;;  %v915_v2 = vpop.permute.xlu0 %914 }
 0x1dc   : > { %994 = vst.msk [vmem:[#allocation2 + $0x98] sm:$0xff] %vm974_vm5, %v917_v0  ;;  %993 = vst.msk [vmem:[#allocation2 + $0x90] sm:$0xff] %vm974_vm5, %v915_v2 }
 0x1dd   : > { %1508 = vrot.lane.b32.xlu1 %v2272_v42, %s2614_s17  ;;  %1506 = vrot.lane.b32.xlu0 %v2271_v38, %s2614_s17 }
 0x1df   : > { %v1106_v44 = vpop.permute.xlu1 %1105  ;;  %v1104_v45 = vpop.permute.xlu0 %1103 }
 0x1e0   : > { %1185 = vst.msk [vmem:[#allocation2 + $0x88] sm:$0xff] %vm1167_vm6, %v1106_v44  ;;  %1184 = vst.msk [vmem:[#allocation2 + $0x80] sm:$0xff] %vm1167_vm6, %v1104_v45 }
 0x1e1   : > { %1512 = vrot.lane.b32.xlu1 %v2368_v46, %s2614_s17  ;;  %1510 = vrot.lane.b32.xlu0 %v2367_v47, %s2614_s17 }
 0x1e3   : > { %v1110_v24 = vpop.permute.xlu1 %1109  ;;  %v1108_v25 = vpop.permute.xlu0 %1107 }
 0x1e4   : > { %1187 = vst.msk [vmem:[#allocation2 + $0x98] sm:$0xff] %vm1167_vm6, %v1110_v24  ;;  %1186 = vst.msk [vmem:[#allocation2 + $0x90] sm:$0xff] %vm1167_vm6, %v1108_v25 }
 0x1e5   : > { %1701 = vrot.lane.b32.xlu1 %v2304_v58, %s2615_s24  ;;  %1699 = vrot.lane.b32.xlu0 %v2303_v59, %s2615_s24 }
 0x1e7   : > { %v1300_v8 = vpop.permute.xlu1 %1299  ;;  %v1298_v9 = vpop.permute.xlu0 %1297 }
 0x1e8   : > { %1379 = vst.msk [vmem:[#allocation2 + $0x88] sm:$0xff] %vm1361_vm7, %v1300_v8  ;;  %1378 = vst.msk [vmem:[#allocation2 + $0x80] sm:$0xff] %vm1361_vm7, %v1298_v9 }
 0x1e9   : > { %1705 = vrot.lane.b32.xlu1 %v2400_v13, %s2615_s24  ;;  %1703 = vrot.lane.b32.xlu0 %v2399_v17, %s2615_s24 }
 0x1eb   : > { %v1304_v62 = vpop.permute.xlu1 %1303  ;;  %v1302_v19 = vpop.permute.xlu0 %1301 }
 0x1ec   : > { %1381 = vst.msk [vmem:[#allocation2 + $0x98] sm:$0xff] %vm1361_vm7, %v1304_v62  ;;  %1380 = vst.msk [vmem:[#allocation2 + $0x90] sm:$0xff] %vm1361_vm7, %v1302_v19 }
 0x1ed   : > { %743 = vrot.lane.b32.xlu1 %v2336_v35, %s2610_s4  ;;  %741 = vrot.lane.b32.xlu0 %v2335_v7, %s2610_s4 }
 0x1ef   : > { %v1493_v20 = vpop.permute.xlu1 %1492  ;;  %v1491_v63 = vpop.permute.xlu0 %1490 }
 0x1f0   : > { %1572 = vst.msk [vmem:[#allocation2 + $0x88] sm:$0xff] %vm1554_vm8, %v1493_v20  ;;  %1571 = vst.msk [vmem:[#allocation2 + $0x80] sm:$0xff] %vm1554_vm8, %v1491_v63 }
 0x1f1   : > { %747 = vrot.lane.b32.xlu1 %v2244_v48, %s2610_s4  ;;  %745 = vrot.lane.b32.xlu0 %v2243_v49, %s2610_s4 }
 0x1f3   : > { %v1497_v26 = vpop.permute.xlu1 %1496  ;;  %v1495_v27 = vpop.permute.xlu0 %1494 }
 0x1f4   : > { %1574 = vst.msk [vmem:[#allocation2 + $0x98] sm:$0xff] %vm1554_vm8, %v1497_v26  ;;  %1573 = vst.msk [vmem:[#allocation2 + $0x90] sm:$0xff] %vm1554_vm8, %v1495_v27 }
 0x1f5   : > { %936 = vrot.lane.b32.xlu1 %v2368_v46, %s2611_s5  ;;  %934 = vrot.lane.b32.xlu0 %v2367_v47, %s2611_s5 }
 0x1f7   : > { %v1686_v36 = vpop.permute.xlu1 %1685  ;;  %v1684_v37 = vpop.permute.xlu0 %1683 }
 0x1f8   : > { %1765 = vst.msk [vmem:[#allocation2 + $0x88] sm:$0xff] %vm1747_vm9, %v1686_v36  ;;  %1764 = vst.msk [vmem:[#allocation2 + $0x80] sm:$0xff] %vm1747_vm9, %v1684_v37 }
 0x1f9   : > { %940 = vrot.lane.b32.xlu1 %v2276_v22, %s2611_s5  ;;  %938 = vrot.lane.b32.xlu0 %v2275_v23, %s2611_s5 }
 0x1fb   : > { %v1690_v10 = vpop.permute.xlu1 %1689  ;;  %v1688_v11 = vpop.permute.xlu0 %1687 }
 0x1fc   : > { %1767 = vst.msk [vmem:[#allocation2 + $0x98] sm:$0xff] %vm1747_vm9, %v1690_v10  ;;  %1766 = vst.msk [vmem:[#allocation2 + $0x90] sm:$0xff] %vm1747_vm9, %v1688_v11 }
 0x1fd   : > { %1129 = vrot.lane.b32.xlu1 %v2400_v13, %s2612_s6  ;;  %1127 = vrot.lane.b32.xlu0 %v2399_v17, %s2612_s6 }
 0x1ff   : > { %v728_v50 = vpop.permute.xlu1 %727  ;;  %v726_v51 = vpop.permute.xlu0 %725  ;;  %v1796_v5 = vld [vmem:[#allocation2 + $0x80] sm:$0xff]  ;;  %v1797_v16 = vld [vmem:[#allocation2 + $0x88] sm:$0xff] }
 0x200   : > { %803 = vst.msk [vmem:[#allocation2 + $0xa8] sm:$0xff] %vm781_vm4, %v728_v50  ;;  %802 = vst.msk [vmem:[#allocation2 + $0xa0] sm:$0xff] %vm781_vm4, %v726_v51  ;;  %v1820_v28 = vpack.c.bf16 %v1797_v16, %v1796_v5 }
 0x201   : > { %1133 = vrot.lane.b32.xlu1 %v2308_v12, %s2612_s6  ;;  %1131 = vrot.lane.b32.xlu0 %v2307_v4, %s2612_s6  ;;  %s3719_s6 = scalar_lea.hbm %s3764_s3, %s2425_s28 }
 0x202   : > { %2469 = vmatprep.mubr.msk.bf16.mxu1 %vm1855_vm10, %v1820_v28 }
 0x203   : > { %v732_v31 = vpop.permute.xlu1 %731  ;;  %v730_v1 = vpop.permute.xlu0 %729  ;;  %v1798_v3 = vld [vmem:[#allocation2 + $0x90] sm:$0xff]  ;;  %v1799_v14 = vld [vmem:[#allocation2 + $0x98] sm:$0xff] }
 0x204   : > { %805 = vst.msk [vmem:[#allocation2 + $0xb8] sm:$0xff] %vm781_vm4, %v732_v31  ;;  %804 = vst.msk [vmem:[#allocation2 + $0xb0] sm:$0xff] %vm781_vm4, %v730_v1  ;;  %v1821_v15 = vpack.c.bf16 %v1799_v14, %v1798_v3 }
 0x205   : > { %1323 = vrot.lane.b32.xlu1 %v2244_v48, %s2613_s7  ;;  %1321 = vrot.lane.b32.xlu0 %v2243_v49, %s2613_s7 }
 0x206   : > { %2470 = vmatmul.mubr.msk.bf16.vlgmr.msra.gmra.mrb[0].mxu1 %vm1855_vm10, %v1821_v15 }
 0x207   : > { %v921_v52 = vpop.permute.xlu1 %920  ;;  %v919_v53 = vpop.permute.xlu0 %918 }
 0x208   : > { %996 = vst.msk [vmem:[#allocation2 + $0xa8] sm:$0xff] %vm974_vm5, %v921_v52  ;;  %995 = vst.msk [vmem:[#allocation2 + $0xa0] sm:$0xff] %vm974_vm5, %v919_v53 }
 0x209   : > { %1327 = vrot.lane.b32.xlu1 %v2340_v60, %s2613_s7  ;;  %1325 = vrot.lane.b32.xlu0 %v2339_v61, %s2613_s7  ;;  %s2141_s7 = scalar_lea.sflag [#allocation4], %s161_s27 }
 0x20b   : > { %v925_v42 = vpop.permute.xlu1 %924  ;;  %v923_v38 = vpop.permute.xlu0 %922 }
 0x20c   : > { %998 = vst.msk [vmem:[#allocation2 + $0xb8] sm:$0xff] %vm974_vm5, %v925_v42  ;;  %997 = vst.msk [vmem:[#allocation2 + $0xb0] sm:$0xff] %vm974_vm5, %v923_v38 }
 0x20d   : > { %1516 = vrot.lane.b32.xlu1 %v2276_v22, %s2614_s17  ;;  %1514 = vrot.lane.b32.xlu0 %v2275_v23, %s2614_s17 }
 0x20f   : > { %v1114_v32 = vpop.permute.xlu1 %1113  ;;  %v1112_v33 = vpop.permute.xlu0 %1111 }
 0x210   : > { %1189 = vst.msk [vmem:[#allocation2 + $0xa8] sm:$0xff] %vm1167_vm6, %v1114_v32  ;;  %1188 = vst.msk [vmem:[#allocation2 + $0xa0] sm:$0xff] %vm1167_vm6, %v1112_v33 }
 0x211   : > { %1520 = vrot.lane.b32.xlu1 %v2372_v39, %s2614_s17  ;;  %1518 = vrot.lane.b32.xlu0 %v2371_v43, %s2614_s17 }
 0x213   : > { %v1118_v58 = vpop.permute.xlu1 %1117  ;;  %v1116_v59 = vpop.permute.xlu0 %1115 }
 0x214   : > { %1191 = vst.msk [vmem:[#allocation2 + $0xb8] sm:$0xff] %vm1167_vm6, %v1118_v58  ;;  %1190 = vst.msk [vmem:[#allocation2 + $0xb0] sm:$0xff] %vm1167_vm6, %v1116_v59 }
 0x215   : > { %1709 = vrot.lane.b32.xlu1 %v2308_v12, %s2615_s24  ;;  %1707 = vrot.lane.b32.xlu0 %v2307_v4, %s2615_s24 }
 0x217   : > { %v1308_v29 = vpop.permute.xlu1 %1307  ;;  %v1306_v30 = vpop.permute.xlu0 %1305 }
 0x218   : > { %1383 = vst.msk [vmem:[#allocation2 + $0xa8] sm:$0xff] %vm1361_vm7, %v1308_v29  ;;  %1382 = vst.msk [vmem:[#allocation2 + $0xa0] sm:$0xff] %vm1361_vm7, %v1306_v30 }
 0x219   : > { %1713 = vrot.lane.b32.xlu1 %v2404_v18, %s2615_s24  ;;  %1711 = vrot.lane.b32.xlu0 %v2403_v21, %s2615_s24 }
 0x21b   : > { %v1312_v54 = vpop.permute.xlu1 %1311  ;;  %v1310_v55 = vpop.permute.xlu0 %1309 }
 0x21c   : > { %1385 = vst.msk [vmem:[#allocation2 + $0xb8] sm:$0xff] %vm1361_vm7, %v1312_v54  ;;  %1384 = vst.msk [vmem:[#allocation2 + $0xb0] sm:$0xff] %vm1361_vm7, %v1310_v55 }
 0x21f   : > { %v1501_v56 = vpop.permute.xlu1 %1500  ;;  %v1499_v6 = vpop.permute.xlu0 %1498 }
 0x220   : > { %1576 = vst.msk [vmem:[#allocation2 + $0xa8] sm:$0xff] %vm1554_vm8, %v1501_v56  ;;  %1575 = vst.msk [vmem:[#allocation2 + $0xa0] sm:$0xff] %vm1554_vm8, %v1499_v6 }
 0x221   : > { %v2455_v57 = vpop.f32.mrb[0].mxu0 }
 0x222   : > { %v1942_v35 = vpop.f32.mrb[1].mxu0  ;;  %v1951_v46 = vadd.f32 %v2455_v57, %v3620_v34 }
 0x223   : > { %v1505_v7 = vpop.permute.xlu1 %1504  ;;  %v1503_v40 = vpop.permute.xlu0 %1502  ;;  %v1943_v41 = vadd.f32 %v3620_v34, %v1942_v35 }
 0x224   : > { %1578 = vst.msk [vmem:[#allocation2 + $0xb8] sm:$0xff] %vm1554_vm8, %v1505_v7  ;;  %1577 = vst.msk [vmem:[#allocation2 + $0xb0] sm:$0xff] %vm1554_vm8, %v1503_v40  ;;  %v2456_v0 = vpop.f32.mrb[2].mxu0  ;;  %v2071_v17 = vmax.f32 %v1951_v46, 0.0 }
 0x225   : > { %v1945_v2 = vpop.f32.mrb[3].mxu0  ;;  %v2069_v24 = vmax.f32 %v1943_v41, 0.0  ;;  %v1954_v25 = vadd.f32 %v2456_v0, %v3620_v34 }
 0x226   : > { %v1946_v47 = vadd.f32 %v3620_v34, %v1945_v2 }
 0x227   : > { %v1694_v44 = vpop.permute.xlu1 %1693  ;;  %v1692_v45 = vpop.permute.xlu0 %1691  ;;  %v2072_v19 = vmax.f32 %v1954_v25, 0.0 }
 0x228   : > { %v2070_v13 = vmax.f32 %v1946_v47, 0.0  ;;  %1769 = vst.msk [vmem:[#allocation2 + $0xa8] sm:$0xff] %vm1747_vm9, %v1694_v44  ;;  %1768 = vst.msk [vmem:[#allocation2 + $0xa0] sm:$0xff] %vm1747_vm9, %v1692_v45 }
 0x22a   : > { %v2101_v8 = vadd.f32 %v2070_v13, %v2069_v24 }
 0x22b   : > { %v1698_v9 = vpop.permute.xlu1 %1697  ;;  %v1696_v62 = vpop.permute.xlu0 %1695 }
 0x22c   : > { %v2102_v48 = vadd.f32 %v2101_v8, %v2071_v17  ;;  %1771 = vst.msk [vmem:[#allocation2 + $0xb8] sm:$0xff] %vm1747_vm9, %v1698_v9  ;;  %1770 = vst.msk [vmem:[#allocation2 + $0xb0] sm:$0xff] %vm1747_vm9, %v1696_v62 }
 0x22e   : > { %v2103_v49 = vadd.f32 %v2102_v48, %v2072_v19 }
 0x22f   : > { %v736_v20 = vpop.permute.xlu1 %735  ;;  %v734_v63 = vpop.permute.xlu0 %733  ;;  %v1800_v26 = vld [vmem:[#allocation2 + $0xa0] sm:$0xff]  ;;  %v1801_v27 = vld [vmem:[#allocation2 + $0xa8] sm:$0xff] }
 0x230   : > { %807 = vst.msk [vmem:[#allocation2 + $0xc8] sm:$0xff] %vm781_vm4, %v736_v20  ;;  %806 = vst.msk [vmem:[#allocation2 + $0xc0] sm:$0xff] %vm781_vm4, %v734_v63  ;;  %v1822_v22 = vpack.c.bf16 %v1801_v27, %v1800_v26 }
 0x232   : > { %2473 = vmatprep.mubr.msk.bf16.mxu1 %vm1855_vm10, %v1822_v22 }
 0x233   : > { %v740_v23 = vpop.permute.xlu1 %739  ;;  %v738_v36 = vpop.permute.xlu0 %737  ;;  %v1802_v37 = vld [vmem:[#allocation2 + $0xb0] sm:$0xff]  ;;  %v1803_v10 = vld [vmem:[#allocation2 + $0xb8] sm:$0xff] }
 0x234   : > { %809 = vst.msk [vmem:[#allocation2 + $0xd8] sm:$0xff] %vm781_vm4, %v740_v23  ;;  %808 = vst.msk [vmem:[#allocation2 + $0xd0] sm:$0xff] %vm781_vm4, %v738_v36  ;;  %v1823_v11 = vpack.c.bf16 %v1803_v10, %v1802_v37 }
 0x236   : > { %2474 = vmatmul.mubr.msk.bf16.gmra.mrb[4].mxu1 %vm1855_vm10, %v1823_v11 }
 0x237   : > { %v929_v12 = vpop.permute.xlu1 %928  ;;  %v927_v4 = vpop.permute.xlu0 %926 }
 0x238   : > { %1000 = vst.msk [vmem:[#allocation2 + $0xc8] sm:$0xff] %vm974_vm5, %v929_v12  ;;  %999 = vst.msk [vmem:[#allocation2 + $0xc0] sm:$0xff] %vm974_vm5, %v927_v4 }
 0x23b   : > { %v933_v50 = vpop.permute.xlu1 %932  ;;  %v931_v51 = vpop.permute.xlu0 %930 }
 0x23c   : > { %1002 = vst.msk [vmem:[#allocation2 + $0xd8] sm:$0xff] %vm974_vm5, %v933_v50  ;;  %1001 = vst.msk [vmem:[#allocation2 + $0xd0] sm:$0xff] %vm974_vm5, %v931_v51 }
 0x23f   : > { %v1122_v5 = vpop.permute.xlu1 %1121  ;;  %v1120_v16 = vpop.permute.xlu0 %1119 }
 0x240   : > { %1193 = vst.msk [vmem:[#allocation2 + $0xc8] sm:$0xff] %vm1167_vm6, %v1122_v5  ;;  %1192 = vst.msk [vmem:[#allocation2 + $0xc0] sm:$0xff] %vm1167_vm6, %v1120_v16 }
 0x243   : > { %v1126_v28 = vpop.permute.xlu1 %1125  ;;  %v1124_v31 = vpop.permute.xlu0 %1123 }
 0x244   : > { %1195 = vst.msk [vmem:[#allocation2 + $0xd8] sm:$0xff] %vm1167_vm6, %v1126_v28  ;;  %1194 = vst.msk [vmem:[#allocation2 + $0xd0] sm:$0xff] %vm1167_vm6, %v1124_v31 }
 0x247   : > { %v1316_v1 = vpop.permute.xlu1 %1315  ;;  %v1314_v3 = vpop.permute.xlu0 %1313 }
 0x248   : > { %1387 = vst.msk [vmem:[#allocation2 + $0xc8] sm:$0xff] %vm1361_vm7, %v1316_v1  ;;  %1386 = vst.msk [vmem:[#allocation2 + $0xc0] sm:$0xff] %vm1361_vm7, %v1314_v3 }
 0x249   : > { %v2459_v14 = vpop.f32.mrb[4].mxu0 }
 0x24a   : > { %v1958_v15 = vpop.f32.mrb[5].mxu0  ;;  %v1967_v39 = vadd.f32 %v2459_v14, %v3620_v34 }
 0x24b   : > { %v1959_v60 = vadd.f32 %v3620_v34, %v1958_v15  ;;  %v1320_v61 = vpop.permute.xlu1 %1319  ;;  %v1318_v52 = vpop.permute.xlu0 %1317 }
 0x24c   : > { %1389 = vst.msk [vmem:[#allocation2 + $0xd8] sm:$0xff] %vm1361_vm7, %v1320_v61  ;;  %1388 = vst.msk [vmem:[#allocation2 + $0xd0] sm:$0xff] %vm1361_vm7, %v1318_v52  ;;  %v2460_v53 = vpop.f32.mrb[6].mxu0  ;;  %v2075_v21 = vmax.f32 %v1967_v39, 0.0 }
 0x24d   : > { %v2073_v42 = vmax.f32 %v1959_v60, 0.0  ;;  %v1961_v38 = vpop.f32.mrb[7].mxu0  ;;  %v1970_v59 = vadd.f32 %v2460_v53, %v3620_v34 }
 0x24e   : > { %v1962_v43 = vadd.f32 %v3620_v34, %v1961_v38 }
 0x24f   : > { %v2104_v32 = vadd.f32 %v2103_v49, %v2073_v42  ;;  %v1509_v33 = vpop.permute.xlu1 %1508  ;;  %v1507_v58 = vpop.permute.xlu0 %1506  ;;  %v2076_v55 = vmax.f32 %v1970_v59, 0.0 }
 0x250   : > { %v2074_v18 = vmax.f32 %v1962_v43, 0.0  ;;  %1580 = vst.msk [vmem:[#allocation2 + $0xc8] sm:$0xff] %vm1554_vm8, %v1509_v33  ;;  %1579 = vst.msk [vmem:[#allocation2 + $0xc0] sm:$0xff] %vm1554_vm8, %v1507_v58 }
 0x252   : > { %v2105_v29 = vadd.f32 %v2104_v32, %v2074_v18 }
 0x253   : > { %v1513_v30 = vpop.permute.xlu1 %1512  ;;  %v1511_v54 = vpop.permute.xlu0 %1510 }
 0x254   : > { %v2106_v56 = vadd.f32 %v2105_v29, %v2075_v21  ;;  %1582 = vst.msk [vmem:[#allocation2 + $0xd8] sm:$0xff] %vm1554_vm8, %v1513_v30  ;;  %1581 = vst.msk [vmem:[#allocation2 + $0xd0] sm:$0xff] %vm1554_vm8, %v1511_v54 }
 0x256   : > { %v2107_v6 = vadd.f32 %v2106_v56, %v2076_v55 }
 0x257   : > { %v1702_v57 = vpop.permute.xlu1 %1701  ;;  %v1700_v35 = vpop.permute.xlu0 %1699 }
 0x258   : > { %1773 = vst.msk [vmem:[#allocation2 + $0xc8] sm:$0xff] %vm1747_vm9, %v1702_v57  ;;  %1772 = vst.msk [vmem:[#allocation2 + $0xc0] sm:$0xff] %vm1747_vm9, %v1700_v35 }
 0x25b   : > { %v1706_v7 = vpop.permute.xlu1 %1705  ;;  %v1704_v40 = vpop.permute.xlu0 %1703 }
 0x25c   : > { %1775 = vst.msk [vmem:[#allocation2 + $0xd8] sm:$0xff] %vm1747_vm9, %v1706_v7  ;;  %1774 = vst.msk [vmem:[#allocation2 + $0xd0] sm:$0xff] %vm1747_vm9, %v1704_v40 }
 0x25f   : > { %v744_v41 = vpop.permute.xlu1 %743  ;;  %v742_v0 = vpop.permute.xlu0 %741  ;;  %v1804_v2 = vld [vmem:[#allocation2 + $0xc0] sm:$0xff]  ;;  %v1805_v46 = vld [vmem:[#allocation2 + $0xc8] sm:$0xff] }
 0x260   : > { %811 = vst.msk [vmem:[#allocation2 + $0xe8] sm:$0xff] %vm781_vm4, %v744_v41  ;;  %810 = vst.msk [vmem:[#allocation2 + $0xe0] sm:$0xff] %vm781_vm4, %v742_v0  ;;  %v1824_v47 = vpack.c.bf16 %v1805_v46, %v1804_v2 }
 0x262   : > { %2477 = vmatprep.mubr.msk.bf16.mxu1 %vm1855_vm10, %v1824_v47 }
 0x263   : > { %v748_v44 = vpop.permute.xlu1 %747  ;;  %v746_v45 = vpop.permute.xlu0 %745  ;;  %v1806_v24 = vld [vmem:[#allocation2 + $0xd0] sm:$0xff]  ;;  %v1807_v25 = vld [vmem:[#allocation2 + $0xd8] sm:$0xff] }
 0x264   : > { %813 = vst.msk [vmem:[#allocation2 + $0xf8] sm:$0xff] %vm781_vm4, %v748_v44  ;;  %812 = vst.msk [vmem:[#allocation2 + $0xf0] sm:$0xff] %vm781_vm4, %v746_v45  ;;  %v1825_v13 = vpack.c.bf16 %v1807_v25, %v1806_v24 }
 0x266   : > { %2478 = vmatmul.mubr.msk.bf16.gmra.mrb[8].mxu1 %vm1855_vm10, %v1825_v13 }
 0x267   : > { %v937_v17 = vpop.permute.xlu1 %936  ;;  %v935_v8 = vpop.permute.xlu0 %934 }
 0x268   : > { %1004 = vst.msk [vmem:[#allocation2 + $0xe8] sm:$0xff] %vm974_vm5, %v937_v17  ;;  %1003 = vst.msk [vmem:[#allocation2 + $0xe0] sm:$0xff] %vm974_vm5, %v935_v8 }
 0x26b   : > { %v941_v9 = vpop.permute.xlu1 %940  ;;  %v939_v62 = vpop.permute.xlu0 %938 }
 0x26c   : > { %1006 = vst.msk [vmem:[#allocation2 + $0xf8] sm:$0xff] %vm974_vm5, %v941_v9  ;;  %1005 = vst.msk [vmem:[#allocation2 + $0xf0] sm:$0xff] %vm974_vm5, %v939_v62 }
 0x26f   : > { %v1130_v19 = vpop.permute.xlu1 %1129  ;;  %v1128_v48 = vpop.permute.xlu0 %1127 }
 0x270   : > { %1197 = vst.msk [vmem:[#allocation2 + $0xe8] sm:$0xff] %vm1167_vm6, %v1130_v19  ;;  %1196 = vst.msk [vmem:[#allocation2 + $0xe0] sm:$0xff] %vm1167_vm6, %v1128_v48 }
 0x273   : > { %v1134_v49 = vpop.permute.xlu1 %1133  ;;  %v1132_v20 = vpop.permute.xlu0 %1131 }
 0x274   : > { %1199 = vst.msk [vmem:[#allocation2 + $0xf8] sm:$0xff] %vm1167_vm6, %v1134_v49  ;;  %1198 = vst.msk [vmem:[#allocation2 + $0xf0] sm:$0xff] %vm1167_vm6, %v1132_v20 }
 0x277   : > { %v1324_v63 = vpop.permute.xlu1 %1323  ;;  %v1322_v26 = vpop.permute.xlu0 %1321 }
 0x278   : > { %1391 = vst.msk [vmem:[#allocation2 + $0xe8] sm:$0xff] %vm1361_vm7, %v1324_v63  ;;  %1390 = vst.msk [vmem:[#allocation2 + $0xe0] sm:$0xff] %vm1361_vm7, %v1322_v26 }
 0x279   : > { %v2463_v27 = vpop.f32.mrb[8].mxu0 }
 0x27a   : > { %v1974_v22 = vpop.f32.mrb[9].mxu0  ;;  %v1983_v4 = vadd.f32 %v2463_v27, %v3620_v34 }
 0x27b   : > { %v1975_v23 = vadd.f32 %v3620_v34, %v1974_v22  ;;  %v1328_v36 = vpop.permute.xlu1 %1327  ;;  %v1326_v37 = vpop.permute.xlu0 %1325 }
 0x27c   : > { %1393 = vst.msk [vmem:[#allocation2 + $0xf8] sm:$0xff] %vm1361_vm7, %v1328_v36  ;;  %1392 = vst.msk [vmem:[#allocation2 + $0xf0] sm:$0xff] %vm1361_vm7, %v1326_v37  ;;  %v2464_v10 = vpop.f32.mrb[10].mxu0  ;;  %v2079_v1 = vmax.f32 %v1983_v4, 0.0 }
 0x27d   : > { %v2077_v11 = vmax.f32 %v1975_v23, 0.0  ;;  %v1977_v12 = vpop.f32.mrb[11].mxu0  ;;  %v1986_v28 = vadd.f32 %v2464_v10, %v3620_v34 }
 0x27e   : > { %v1978_v50 = vadd.f32 %v3620_v34, %v1977_v12 }
 0x27f   : > { %v2108_v51 = vadd.f32 %v2107_v6, %v2077_v11  ;;  %v1517_v5 = vpop.permute.xlu1 %1516  ;;  %v1515_v16 = vpop.permute.xlu0 %1514  ;;  %v2080_v60 = vmax.f32 %v1986_v28, 0.0 }
 0x280   : > { %v2078_v31 = vmax.f32 %v1978_v50, 0.0  ;;  %1584 = vst.msk [vmem:[#allocation2 + $0xe8] sm:$0xff] %vm1554_vm8, %v1517_v5  ;;  %1583 = vst.msk [vmem:[#allocation2 + $0xe0] sm:$0xff] %vm1554_vm8, %v1515_v16 }
 0x282   : > { %v2109_v3 = vadd.f32 %v2108_v51, %v2078_v31 }
 0x283   : > { %v1521_v14 = vpop.permute.xlu1 %1520  ;;  %v1519_v15 = vpop.permute.xlu0 %1518 }
 0x284   : > { %v2110_v61 = vadd.f32 %v2109_v3, %v2079_v1  ;;  %1586 = vst.msk [vmem:[#allocation2 + $0xf8] sm:$0xff] %vm1554_vm8, %v1521_v14  ;;  %1585 = vst.msk [vmem:[#allocation2 + $0xf0] sm:$0xff] %vm1554_vm8, %v1519_v15 }
 0x286   : > { %v2111_v52 = vadd.f32 %v2110_v61, %v2080_v60 }
 0x287   : > { %v1710_v53 = vpop.permute.xlu1 %1709  ;;  %v1708_v42 = vpop.permute.xlu0 %1707 }
 0x288   : > { %1777 = vst.msk [vmem:[#allocation2 + $0xe8] sm:$0xff] %vm1747_vm9, %v1710_v53  ;;  %1776 = vst.msk [vmem:[#allocation2 + $0xe0] sm:$0xff] %vm1747_vm9, %v1708_v42 }
 0x28b   : > { %v1714_v38 = vpop.permute.xlu1 %1713  ;;  %v1712_v39 = vpop.permute.xlu0 %1711 }
 0x28c   : > { %1779 = vst.msk [vmem:[#allocation2 + $0xf8] sm:$0xff] %vm1747_vm9, %v1714_v38  ;;  %1778 = vst.msk [vmem:[#allocation2 + $0xf0] sm:$0xff] %vm1747_vm9, %v1712_v39 }
 0x28f   : > { %v1808_v43 = vld [vmem:[#allocation2 + $0xe0] sm:$0xff]  ;;  %v1809_v32 = vld [vmem:[#allocation2 + $0xe8] sm:$0xff] }
 0x290   : > { %v1826_v33 = vpack.c.bf16 %v1809_v32, %v1808_v43 }
 0x292   : > { %2481 = vmatprep.mubr.msk.bf16.mxu1 %vm1855_vm10, %v1826_v33 }
 0x293   : > { %v1810_v58 = vld [vmem:[#allocation2 + $0xf0] sm:$0xff]  ;;  %v1811_v59 = vld [vmem:[#allocation2 + $0xf8] sm:$0xff] }
 0x294   : > { %v1827_v18 = vpack.c.bf16 %v1811_v59, %v1810_v58 }
 0x296   : > { %2482 = vmatmul.mubr.msk.bf16.gmra.mrb[12].mxu1 %vm1855_vm10, %v1827_v18 }
 0x2a9   : > { %v2467_v21 = vpop.f32.mrb[12].mxu0 }
 0x2aa   : > { %v1990_v29 = vpop.f32.mrb[13].mxu0  ;;  %v1999_v56 = vadd.f32 %v2467_v21, %v3620_v34 }
 0x2ab   : > { %v1991_v30 = vadd.f32 %v3620_v34, %v1990_v29  ;;  %v2468_v54 = vpop.f32.mrb[14].mxu0 }
 0x2ac   : > { %v1993_v55 = vpop.f32.mrb[15].mxu0  ;;  %v2002_v7 = vadd.f32 %v2468_v54, %v3620_v34  ;;  %v2083_v41 = vmax.f32 %v1999_v56, 0.0 }
 0x2ad   : > { %v2081_v6 = vmax.f32 %v1991_v30, 0.0  ;;  %v1994_v57 = vadd.f32 %v3620_v34, %v1993_v55 }
 0x2ae   : > { %v2084_v2 = vmax.f32 %v2002_v7, 0.0 }
 0x2af   : > { %v2112_v35 = vadd.f32 %v2111_v52, %v2081_v6  ;;  %v2082_v40 = vmax.f32 %v1994_v57, 0.0 }
 0x2b1   : > { %v2113_v0 = vadd.f32 %v2112_v35, %v2082_v40 }
 0x2b3   : > { %v2114_v46 = vadd.f32 %v2113_v0, %v2083_v41 }
 0x2b5   : > { %v2115_v47 = vadd.f32 %v2114_v46, %v2084_v2 }
 0x2d9   : > { %v2471_v44 = vpop.f32.mrb[0].mxu1 }
 0x2da   : > { %v2006_v45 = vpop.f32.mrb[1].mxu1  ;;  %v2015_v17 = vadd.f32 %v2471_v44, %v3620_v34 }
 0x2db   : > { %v2007_v24 = vadd.f32 %v3620_v34, %v2006_v45  ;;  %v2472_v25 = vpop.f32.mrb[2].mxu1 }
 0x2dc   : > { %v2009_v13 = vpop.f32.mrb[3].mxu1  ;;  %v2018_v19 = vadd.f32 %v2472_v25, %v3620_v34  ;;  %v2087_v49 = vmax.f32 %v2015_v17, 0.0 }
 0x2dd   : > { %v2085_v8 = vmax.f32 %v2007_v24, 0.0  ;;  %v2010_v9 = vadd.f32 %v3620_v34, %v2009_v13 }
 0x2de   : > { %v2088_v63 = vmax.f32 %v2018_v19, 0.0 }
 0x2df   : > { %v2116_v62 = vadd.f32 %v2115_v47, %v2085_v8  ;;  %v2086_v48 = vmax.f32 %v2010_v9, 0.0 }
 0x2e1   : > { %v2117_v20 = vadd.f32 %v2116_v62, %v2086_v48 }
 0x2e3   : > { %v2118_v26 = vadd.f32 %v2117_v20, %v2087_v49 }
 0x2e5   : > { %v2119_v27 = vadd.f32 %v2118_v26, %v2088_v63 }
 0x309   : > { %v2475_v22 = vpop.f32.mrb[4].mxu1 }
 0x30a   : > { %v2022_v23 = vpop.f32.mrb[5].mxu1  ;;  %v2031_v11 = vadd.f32 %v2475_v22, %v3620_v34 }
 0x30b   : > { %v2023_v36 = vadd.f32 %v3620_v34, %v2022_v23  ;;  %v2476_v37 = vpop.f32.mrb[6].mxu1 }
 0x30c   : > { %v2025_v10 = vpop.f32.mrb[7].mxu1  ;;  %v2034_v51 = vadd.f32 %v2476_v37, %v3620_v34  ;;  %v2091_v16 = vmax.f32 %v2031_v11, 0.0 }
 0x30d   : > { %v2089_v12 = vmax.f32 %v2023_v36, 0.0  ;;  %v2026_v4 = vadd.f32 %v3620_v34, %v2025_v10 }
 0x30e   : > { %v2092_v31 = vmax.f32 %v2034_v51, 0.0 }
 0x30f   : > { %v2120_v50 = vadd.f32 %v2119_v27, %v2089_v12  ;;  %v2090_v5 = vmax.f32 %v2026_v4, 0.0 }
 0x311   : > { %v2121_v28 = vadd.f32 %v2120_v50, %v2090_v5 }
 0x313   : > { %v2122_v1 = vadd.f32 %v2121_v28, %v2091_v16 }
 0x315   : > { %v2123_v3 = vadd.f32 %v2122_v1, %v2092_v31 }
 0x339   : > { %v2479_v14 = vpop.f32.mrb[8].mxu1 }
 0x33a   : > { %v2038_v15 = vpop.f32.mrb[9].mxu1  ;;  %v2047_v53 = vadd.f32 %v2479_v14, %v3620_v34 }
 0x33b   : > { %v2039_v60 = vadd.f32 %v3620_v34, %v2038_v15  ;;  %v2480_v61 = vpop.f32.mrb[10].mxu1 }
 0x33c   : > { %v2041_v52 = vpop.f32.mrb[11].mxu1  ;;  %v2050_v43 = vadd.f32 %v2480_v61, %v3620_v34  ;;  %v2095_v33 = vmax.f32 %v2047_v53, 0.0 }
 0x33d   : > { %v2093_v42 = vmax.f32 %v2039_v60, 0.0  ;;  %v2042_v38 = vadd.f32 %v3620_v34, %v2041_v52 }
 0x33e   : > { %v2096_v59 = vmax.f32 %v2050_v43, 0.0 }
 0x33f   : > { %v2124_v39 = vadd.f32 %v2123_v3, %v2093_v42  ;;  %v2094_v32 = vmax.f32 %v2042_v38, 0.0 }
 0x341   : > { %v2125_v58 = vadd.f32 %v2124_v39, %v2094_v32 }
 0x343   : > { %v2126_v18 = vadd.f32 %v2125_v58, %v2095_v33 }
 0x345   : > { %v2127_v21 = vadd.f32 %v2126_v18, %v2096_v59 }
 0x369   : > { %v2483_v29 = vpop.f32.mrb[12].mxu1 }
 0x36a   : > { %v2054_v30 = vpop.f32.mrb[13].mxu1  ;;  %v2063_v6 = vadd.f32 %v2483_v29, %v3620_v34 }
 0x36b   : > { %v2055_v54 = vadd.f32 %v3620_v34, %v2054_v30  ;;  %v2484_v55 = vpop.f32.mrb[14].mxu1 }
 0x36c   : > { %v2057_v56 = vpop.f32.mrb[15].mxu1  ;;  %v2066_v40 = vadd.f32 %v2484_v55, %v3620_v34  ;;  %v2099_v0 = vmax.f32 %v2063_v6, 0.0 }
 0x36d   : > { %v2097_v57 = vmax.f32 %v2055_v54, 0.0  ;;  %v2058_v35 = vadd.f32 %v3620_v34, %v2057_v56 }
 0x36e   : > { %v2100_v46 = vmax.f32 %v2066_v40, 0.0 }
 0x36f   : > { %v2128_v7 = vadd.f32 %v2127_v21, %v2097_v57  ;;  %v2098_v41 = vmax.f32 %v2058_v35, 0.0 }
 0x371   : > { %v2129_v2 = vadd.f32 %v2128_v7, %v2098_v41 }
 0x373   : > { %v2130_v47 = vadd.f32 %v2129_v2, %v2099_v0 }
 0x375   : > { %v2131_v44 = vadd.f32 %v2130_v47, %v2100_v46 }
 0x377   : > { %v2132_v45 = vrot.slane %v2131_v44, 4 }
 0x379   : > { %v2133_v24 = vadd.f32 %v2132_v45, %v2131_v44 }
 0x37b   : > { %v2134_v25 = vrot.slane %v2133_v24, 2 }
 0x37d   : > { %v2135_v13 = vadd.f32 %v2134_v25, %v2133_v24 }
 0x37f   : > { %v2136_v17 = vrot.slane %v2135_v13, 1 }
 0x381   : > { %v2137_v8 = vadd.f32 %v2136_v17, %v2135_v13 }
 0x383   : > { %v2138_v9 = vmul.f32 0.00390625, %v2137_v8 }
 0x385   : > { %2139 = vst [vmem:[%s162_s29] sm:$0x1] %v2138_v9 }
 0x386   : > { %2557 = shalt.err (!%p2554_p3)
}
 0x387   : > { %s2558_s11 = scalar_lea.hbm %s3719_s6, 16  ;;  %s2562_s20 = scalar_lea.hbm %s3764_s3, 32 }
 0x388   : > { %p2559_p4 = scmp.ne.s32.totalorder %s3719_s6, %s2558_s11  ;;  %p2563_p9 = scmp.lt.u32.totalorder %s3719_s6, %s3764_s3 }
 0x389   : > { %p2564_p10 = scmp.lt.u32.totalorder %s2562_s20, %s2558_s11  ;;  %p2566_p12 = scmp.lt.u32.totalorder %s2558_s11, %s3719_s6 }
 0x38a   : > { %p2560_p7 = pnand %p2559_p4, %p2675_p5 }
 0x38b   : > { %p2565_p11 = por %p2564_p10, %p2563_p9 }
 0x38c   : > { %p2561_p8 = pneg %p2560_p7 }
 0x38d   : > { %p2567_p13 = por %p2566_p12, %p2565_p11 }
 0x38f   : > { %p2568_p0 = pnand %p2567_p13, %p2561_p8 }
 0x391   : > { %2571 = shalt.err (!%p2568_p0)
}
 0x392   : > { %2494 = dma.vmem_to_hbm [thread:$0]  (%p2675_p5), %s3721_s30, 16, %s3719_s6, %s2141_s7  }
 0x393 PF: > { %p2500_p1 = scmp.ge.s32.totalorder %s2606_s15, 2  ;;  %s2165_s26 = sand.u32 1, %s2594_s12  }
 0x394   : > { %s2166_s27 = scalar_lea.sflag [#allocation4], %s2165_s26 }
 0x395   : > { %p2497_p2 = pnand %p2500_p1, %p2679_p6 }
 0x397   : > { %2589 = dma.done.wait (!%p2497_p2), %s2166_s27, 16  }
 0x398   : > { %2591 = vsyncadd (!%p2497_p2), %s2166_s27, 4294967280  ;;  %p13_p3 = scmp.ge.s32.totalorder %s2662_s18, 4   ;;  %s3773_s12 = smov %s2598_s13 }
 0x399   : > { %s3774_s13 = smov %s2602_s14  ;;  %s3775_s14 = smov %s2673_s21 }
 0x39a   : > { %s3776_s15 = smov %s2662_s18  ;;  %15 = sbr.rel (!%p13_p3) target bundleno = 3 (0x3), region = 69 }
 0x3a1   :  { %2170 = vsyncpa [#allocation4], 1 }
 0x3a2   :  { %2172 = vsyncpa [#allocation4 + $0x1], 1 }

</bundles_post_ra>
